<compile_context>
chip_gen: v7x
topology: tpu7x:2x2x1
jax: 0.10.0
libtpu: 0.0.40
codegen_flags: <defaults>
</compile_context>

<pallas_src>
import numpy as np
import jax
import jax.numpy as jnp
from jax.experimental import pallas as pl
from jax.experimental.pallas import tpu as pltpu


# ----------------------------------------------------------------------------
# Host-side one-time folding of each layer into dense matmul operands.
# Flat layout convention: feature index = c * L + l  (channel-major), which is
# exactly PyTorch's x.view(B, -1) order, so the bottleneck Linears and the
# channel concat need no in-kernel relayout at all.
# ----------------------------------------------------------------------------
def _conv1d_as_matmul(w, b, L):
    """'same'-padded stride-1 Conv1d as y_flat = x_flat @ M + b_flat."""
    w = np.asarray(w, np.float32)            # (Cout, Cin, K)
    b = np.asarray(b, np.float32)            # (Cout,)
    Cout, Cin, K = w.shape
    pad = (K - 1) // 2
    M = np.zeros((Cin * L, Cout * L), np.float32)
    for t in range(K):
        s = t - pad
        for lp in range(L):
            l = lp + s
            if 0 <= l < L:
                for j in range(Cout):
                    for c in range(Cin):
                        M[c * L + l, j * L + lp] = w[j, c, t]
    bf = np.repeat(b, L)[None, :]            # (1, Cout*L)
    return M, bf


def _maxpool2_mats(C, L):
    """MaxPool1d(2,2): out = max(x_flat @ pe, x_flat @ po)."""
    Lh = L // 2
    pe = np.zeros((C * L, C * Lh), np.float32)
    po = np.zeros((C * L, C * Lh), np.float32)
    for c in range(C):
        for m in range(Lh):
            pe[c * L + 2 * m, c * Lh + m] = 1.0
            po[c * L + 2 * m + 1, c * Lh + m] = 1.0
    return pe, po


def _upsample2_mat(C, L):
    """Nearest-neighbor x2 upsample: out_flat = x_flat @ U."""
    U = np.zeros((C * L, 2 * C * L), np.float32)
    for c in range(C):
        for p in range(L):
            U[c * L + p, c * 2 * L + 2 * p] = 1.0
            U[c * L + p, c * 2 * L + 2 * p + 1] = 1.0
    return U


def prepare_params(params, L):
    """One-time host-side layout / operator folding (hoisted out of the kernel)."""
    lens = (L, L // 2, L // 4, L // 8)
    prep = {}

    # encoder convs (conv_i runs at length lens[i-1])
    for i in range(4):
        M, bf = _conv1d_as_matmul(*params[f"conv{i + 1}"], lens[i])
        prep[f"conv{i + 1}"] = (jnp.asarray(M), jnp.asarray(bf))

    # maxpools applied to conv1..conv3 outputs
    for i in range(3):
        cout = int(np.asarray(params[f"conv{i + 1}"][0]).shape[0])
        pe, po = _maxpool2_mats(cout, lens[i])
        prep[f"pool{i + 1}"] = (jnp.asarray(pe), jnp.asarray(po))

    # bottleneck: the 4 Linear->tanh->Linear->tanh modules, latents packed into
    # one (B, sum(latent)) value via zero-padded block weights.
    lat_sizes = [int(np.asarray(params[f"kernel{i + 1}"][1]).shape[0]) for i in range(4)]
    lat_total = sum(lat_sizes)
    wen_list, wde_list, bde_list, ben_cat = [], [], [], []
    off = 0
    for i in range(4):
        wen, ben, wde, bde = params[f"kernel{i + 1}"]
        wen = np.asarray(wen, np.float32)    # (latent, C*L)
        wde = np.asarray(wde, np.float32)    # (C*L, latent)
        ls, f = wen.shape
        enc = np.zeros((f, lat_total), np.float32)
        enc[:, off:off + ls] = wen.T                      # (C*L, lat_total)
        dec = np.zeros((lat_total, f), np.float32)
        dec[off:off + ls, :] = wde.T                      # (lat_total, C*L)
        wen_list.append(jnp.asarray(enc))
        wde_list.append(jnp.asarray(dec))
        bde_list.append(jnp.asarray(np.asarray(bde, np.float32)[None, :]))
        ben_cat.append(np.asarray(ben, np.float32))
        off += ls
    prep["wen"] = tuple(wen_list)
    prep["ben_all"] = jnp.asarray(np.concatenate(ben_cat)[None, :])
    prep["wde"] = tuple(wde_list)
    prep["bde"] = tuple(bde_list)
    prep_lat_sizes = tuple(lat_sizes)

    # decoder: deconv1 plain; deconv2..4 get their torch.cat([upsampled, skip])
    # input folded into a row-split of the conv matrix (up rows first - matches
    # the reference's torch.cat([up, k], 1) ordering).
    M, bf = _conv1d_as_matmul(*params["deconv1"], lens[3])
    prep["deconv1"] = (jnp.asarray(M), jnp.asarray(bf))
    dec_cfg = [("deconv2", lens[2], "deconv1"),
               ("deconv3", lens[1], "deconv2"),
               ("deconv4", lens[0], "deconv3")]
    for idx, (name, Lc, prev) in enumerate(dec_cfg):
        up_c = int(np.asarray(params[prev][0]).shape[0])  # channels of upsampled path
        prep[f"up{idx + 2}"] = jnp.asarray(_upsample2_mat(up_c, Lc // 2))
        M, bf = _conv1d_as_matmul(*params[name], Lc)
        prep[name] = (jnp.asarray(M[:up_c * Lc]),         # rows for upsampled path
                      jnp.asarray(M[up_c * Lc:]),         # rows for skip path
                      jnp.asarray(bf))
    return prep, prep_lat_sizes


# ----------------------------------------------------------------------------
# The single fused kernel: everything is a 2-D matmul / elementwise op on a
# (B, features) tile with features on lanes.  No loops, no reshapes, no
# concats, no in-kernel constant construction; exactly two output stores.
# ----------------------------------------------------------------------------
def _autoencoder_kernel(
    x_ref,
    c1m, c1b, c2m, c2b, c3m, c3b, c4m, c4b,
    pe1, po1, pe2, po2, pe3, po3,
    we1, we2, we3, we4, benc,
    wd1, wd2, wd3, wd4, bd1, bd2, bd3, bd4,
    d1m, d1b,
    u2m, d2mu, d2ms, d2b,
    u3m, d3mu, d3ms, d3b,
    u4m, d4mu, d4ms, d4b,
    dc4_ref, lat_ref,
):
    def mm(a, b):
        return jnp.dot(a, b, preferred_element_type=jnp.float32)

    def pool(a, pe, po):                      # MaxPool1d(2,2) on the flat layout
        return jnp.maximum(mm(a, pe[...]), mm(a, po[...]))

    x = x_ref[...]
    # encoder: conv(+ReLU) folded into one matmul per layer, maxpool fused
    c1 = jnp.maximum(mm(x, c1m[...]) + c1b[...], 0.0)
    c2 = jnp.maximum(mm(pool(c1, pe1, po1), c2m[...]) + c2b[...], 0.0)
    c3 = jnp.maximum(mm(pool(c2, pe2, po2), c3m[...]) + c3b[...], 0.0)
    c4 = jnp.maximum(mm(pool(c3, pe3, po3), c4m[...]) + c4b[...], 0.0)

    # four bottleneck `kernel` modules fused via zero-padded block weights;
    # lat is the packed [l1 | l2 | l3 | l4] latent output.
    lat = jnp.tanh(mm(c1, we1[...]) + mm(c2, we2[...]) +
                   mm(c3, we3[...]) + mm(c4, we4[...]) + benc[...])
    lat_ref[...] = lat
    k1 = jnp.tanh(mm(lat, wd1[...]) + bd1[...])
    k2 = jnp.tanh(mm(lat, wd2[...]) + bd2[...])
    k3 = jnp.tanh(mm(lat, wd3[...]) + bd3[...])
    k4 = jnp.tanh(mm(lat, wd4[...]) + bd4[...])

    # decoder: nearest x2 upsample + channel concat + conv folded into matmuls
    d1 = jnp.tanh(mm(k4, d1m[...]) + d1b[...])
    d2 = jnp.tanh(mm(mm(d1, u2m[...]), d2mu[...]) + mm(k3, d2ms[...]) + d2b[...])
    d3 = jnp.tanh(mm(mm(d2, u3m[...]), d3mu[...]) + mm(k2, d3ms[...]) + d3b[...])
    d4 = jnp.tanh(mm(mm(d3, u4m[...]), d4mu[...]) + mm(k1, d4ms[...]) + d4b[...])
    dc4_ref[...] = d4


# ----------------------------------------------------------------------------
# Forward wrapper: one pallas_call, jitted; latent unpack + D2H done once after.
# ----------------------------------------------------------------------------
def _forward(prep, x):
    B = x.shape[0]
    xf = x.reshape(B, -1)                                   # (B, Cin*L), Cin == 1
    operands = (
        xf,
        prep["conv1"][0], prep["conv1"][1],
        prep["conv2"][0], prep["conv2"][1],
        prep["conv3"][0], prep["conv3"][1],
        prep["conv4"][0], prep["conv4"][1],
        prep["pool1"][0], prep["pool1"][1],
        prep["pool2"][0], prep["pool2"][1],
        prep["pool3"][0], prep["pool3"][1],
        prep["wen"][0], prep["wen"][1], prep["wen"][2], prep["wen"][3],
        prep["ben_all"],
        prep["wde"][0], prep["wde"][1], prep["wde"][2], prep["wde"][3],
        prep["bde"][0], prep["bde"][1], prep["bde"][2], prep["bde"][3],
        prep["deconv1"][0], prep["deconv1"][1],
        prep["up2"], prep["deconv2"][0], prep["deconv2"][1], prep["deconv2"][2],
        prep["up3"], prep["deconv3"][0], prep["deconv3"][1], prep["deconv3"][2],
        prep["up4"], prep["deconv4"][0], prep["deconv4"][1], prep["deconv4"][2],
    )
    out_len = prep["deconv4"][0].shape[1]                   # Cout_final * L (= L)
    lat_total = prep["ben_all"].shape[1]
    vmem = pl.BlockSpec(memory_space=pltpu.MemorySpace.VMEM)
    dc4_flat, lat = pl.pallas_call(
        _autoencoder_kernel,
        out_shape=(jax.ShapeDtypeStruct((B, out_len), jnp.float32),
                   jax.ShapeDtypeStruct((B, lat_total), jnp.float32)),
        in_specs=[vmem] * len(operands),
        out_specs=(vmem, vmem),
    )(*operands)
    return dc4_flat.reshape(B, 1, out_len), lat


_forward_jit = jax.jit(_forward)


def autoencoder_forward(prep, x, latent_sizes):
    dc4, lat_packed = _forward_jit(prep, x)
    dc4 = jax.block_until_ready(dc4)
    lat_np = np.asarray(lat_packed)                         # single host fetch
    offs = np.cumsum([0] + list(latent_sizes))
    featmap = [lat_np[:, offs[i]:offs[i + 1]] for i in range(4)]
    return dc4, featmap


# ----------------------------------------------------------------------------
# Pure-NumPy restatement of the PyTorch forward (used as a correctness check).
# ----------------------------------------------------------------------------
def _reference_forward(params, x):
    x = np.asarray(x, np.float32)

    def conv1d_same(xx, w, b):
        w = np.asarray(w, np.float32)
        b = np.asarray(b, np.float32)
        Bb, Cin, Lx = xx.shape
        Cout, _, K = w.shape
        pad = (K - 1) // 2
        xp = np.pad(xx, ((0, 0), (0, 0), (pad, pad)))
        y = np.zeros((Bb, Cout, Lx), np.float32)
        for t in range(K):
            y += np.einsum("oc,bcl->bol", w[:, :, t], xp[:, :, t:t + Lx])
        return y + b[None, :, None]

    def maxpool2(xx):
        return np.maximum(xx[:, :, 0::2], xx[:, :, 1::2])

    def up2(xx):
        return np.repeat(xx, 2, axis=2)

    def bottleneck(xx, p):
        wen, ben, wde, bde = (np.asarray(t, np.float32) for t in p)
        flat = xx.reshape(xx.shape[0], -1)
        lat = np.tanh(flat @ wen.T + ben)
        rec = np.tanh(lat @ wde.T + bde)
        return rec.reshape(xx.shape), lat

    c1 = np.maximum(conv1d_same(x, *params["conv1"]), 0.0)
    c2 = np.maximum(conv1d_same(maxpool2(c1), *params["conv2"]), 0.0)
    c3 = np.maximum(conv1d_same(maxpool2(c2), *params["conv3"]), 0.0)
    c4 = np.maximum(conv1d_same(maxpool2(c3), *params["conv4"]), 0.0)
    k1, l1 = bottleneck(c1, params["kernel1"])
    k2, l2 = bottleneck(c2, params["kernel2"])
    k3, l3 = bottleneck(c3, params["kernel3"])
    k4, l4 = bottleneck(c4, params["kernel4"])
    d1 = np.tanh(conv1d_same(k4, *params["deconv1"]))
    d2 = np.tanh(conv1d_same(np.concatenate([up2(d1), k3], 1), *params["deconv2"]))
    d3 = np.tanh(conv1d_same(np.concatenate([up2(d2), k2], 1), *params["deconv3"]))
    d4 = np.tanh(conv1d_same(np.concatenate([up2(d3), k1], 1), *params["deconv4"]))
    return d4, [l1, l2, l3, l4]


# ----------------------------------------------------------------------------
# Deterministic parameter init (mirrors PyTorch default uniform fan-in init)
# ----------------------------------------------------------------------------
def init_conv(key, cin, cout, k):
    k1, k2 = jax.random.split(key)
    bound = 1.0 / np.sqrt(cin * k)
    w = jax.random.uniform(k1, (cout, cin, k), jnp.float32, -bound, bound)
    b = jax.random.uniform(k2, (cout,), jnp.float32, -bound, bound)
    return w, b


def init_linear(key, fin, fout):
    k1, k2 = jax.random.split(key)
    bound = 1.0 / np.sqrt(fin)
    w = jax.random.uniform(k1, (fout, fin), jnp.float32, -bound, bound)
    b = jax.random.uniform(k2, (fout,), jnp.float32, -bound, bound)
    return w, b


def init_kernel(key, channel, input_size, latent_size):
    k1, k2 = jax.random.split(key)
    wen, ben = init_linear(k1, channel * input_size, latent_size)
    wde, bde = init_linear(k2, latent_size, channel * input_size)
    return wen, ben, wde, bde


if __name__ == "__main__":
    B, L = 2, 16
    kernel_size = [3, 3, 3, 3]
    kernel_num = [4, 8, 16, 32]
    latent_size = [8, 8, 8, 8]

    key = jax.random.PRNGKey(0)
    xkey, pkey = jax.random.split(key)
    x = jax.random.normal(xkey, (B, 1, L), jnp.float32)

    keys = jax.random.split(pkey, 12)
    params = {
        "conv1": init_conv(keys[0], 1,             kernel_num[0], kernel_size[0]),
        "conv2": init_conv(keys[1], kernel_num[0], kernel_num[1], kernel_size[1]),
        "conv3": init_conv(keys[2], kernel_num[1], kernel_num[2], kernel_size[2]),
        "conv4": init_conv(keys[3], kernel_num[2], kernel_num[3], kernel_size[3]),
        "kernel1": init_kernel(keys[4], kernel_num[0], L,      latent_size[0]),
        "kernel2": init_kernel(keys[5], kernel_num[1], L // 2, latent_size[1]),
        "kernel3": init_kernel(keys[6], kernel_num[2], L // 4, latent_size[2]),
        "kernel4": init_kernel(keys[7], kernel_num[3], L // 8, latent_size[3]),
        "deconv1": init_conv(keys[8],  kernel_num[3],     kernel_num[2], kernel_size[3]),
        "deconv2": init_conv(keys[9],  kernel_num[2] * 2, kernel_num[1], kernel_size[2]),
        "deconv3": init_conv(keys[10], kernel_num[1] * 2, kernel_num[0], kernel_size[1]),
        "deconv4": init_conv(keys[11], kernel_num[0] * 2, 1,             kernel_size[0]),
    }

    prep, lat_sizes = prepare_params(params, L)              # one-time host prep
    dc4, featmap = autoencoder_forward(prep, x, lat_sizes)   # compile + run
    dc4, featmap = autoencoder_forward(prep, x, lat_sizes)   # steady-state run

    assert dc4.shape == (B, 1, L), dc4.shape
    assert all(f.shape == (B, latent_size[i]) for i, f in enumerate(featmap))
    assert np.all(np.isfinite(np.asarray(dc4)))
    assert all(np.all(np.isfinite(f)) for f in featmap)

    # numerical check vs a pure-NumPy restatement of the PyTorch forward
    # (loose tolerance to absorb MXU f32 matmul pass precision)
    ref_dc4, ref_feat = _reference_forward(params, np.asarray(x))
    np.testing.assert_allclose(np.asarray(dc4), ref_dc4, atol=5e-2)
    for f, rf in zip(featmap, ref_feat):
        np.testing.assert_allclose(f, rf, atol=5e-2)

    print("KERNEL_OK")
</pallas_src>

<mosaic_0001>
module attributes {stable_mosaic.version = 11 : i64} {
  func.func @_autoencoder_kernel(%arg0: memref<2x16xf32, #tpu.memory_space<vmem>>, %arg1: memref<16x64xf32, #tpu.memory_space<vmem>>, %arg2: memref<1x64xf32, #tpu.memory_space<vmem>>, %arg3: memref<32x64xf32, #tpu.memory_space<vmem>>, %arg4: memref<1x64xf32, #tpu.memory_space<vmem>>, %arg5: memref<32x64xf32, #tpu.memory_space<vmem>>, %arg6: memref<1x64xf32, #tpu.memory_space<vmem>>, %arg7: memref<32x64xf32, #tpu.memory_space<vmem>>, %arg8: memref<1x64xf32, #tpu.memory_space<vmem>>, %arg9: memref<64x32xf32, #tpu.memory_space<vmem>>, %arg10: memref<64x32xf32, #tpu.memory_space<vmem>>, %arg11: memref<64x32xf32, #tpu.memory_space<vmem>>, %arg12: memref<64x32xf32, #tpu.memory_space<vmem>>, %arg13: memref<64x32xf32, #tpu.memory_space<vmem>>, %arg14: memref<64x32xf32, #tpu.memory_space<vmem>>, %arg15: memref<64x32xf32, #tpu.memory_space<vmem>>, %arg16: memref<64x32xf32, #tpu.memory_space<vmem>>, %arg17: memref<64x32xf32, #tpu.memory_space<vmem>>, %arg18: memref<64x32xf32, #tpu.memory_space<vmem>>, %arg19: memref<1x32xf32, #tpu.memory_space<vmem>>, %arg20: memref<32x64xf32, #tpu.memory_space<vmem>>, %arg21: memref<32x64xf32, #tpu.memory_space<vmem>>, %arg22: memref<32x64xf32, #tpu.memory_space<vmem>>, %arg23: memref<32x64xf32, #tpu.memory_space<vmem>>, %arg24: memref<1x64xf32, #tpu.memory_space<vmem>>, %arg25: memref<1x64xf32, #tpu.memory_space<vmem>>, %arg26: memref<1x64xf32, #tpu.memory_space<vmem>>, %arg27: memref<1x64xf32, #tpu.memory_space<vmem>>, %arg28: memref<64x32xf32, #tpu.memory_space<vmem>>, %arg29: memref<1x32xf32, #tpu.memory_space<vmem>>, %arg30: memref<32x64xf32, #tpu.memory_space<vmem>>, %arg31: memref<64x32xf32, #tpu.memory_space<vmem>>, %arg32: memref<64x32xf32, #tpu.memory_space<vmem>>, %arg33: memref<1x32xf32, #tpu.memory_space<vmem>>, %arg34: memref<32x64xf32, #tpu.memory_space<vmem>>, %arg35: memref<64x32xf32, #tpu.memory_space<vmem>>, %arg36: memref<64x32xf32, #tpu.memory_space<vmem>>, %arg37: memref<1x32xf32, #tpu.memory_space<vmem>>, %arg38: memref<32x64xf32, #tpu.memory_space<vmem>>, %arg39: memref<64x16xf32, #tpu.memory_space<vmem>>, %arg40: memref<64x16xf32, #tpu.memory_space<vmem>>, %arg41: memref<1x16xf32, #tpu.memory_space<vmem>>, %arg42: memref<2x16xf32, #tpu.memory_space<vmem>>, %arg43: memref<2x32xf32, #tpu.memory_space<vmem>>) attributes {dimension_semantics = [], scalar_prefetch = 0 : i64, scratch_operands = 0 : i64, tpu.core_type = #tpu.core_type<tc>} {
    %c0 = arith.constant 0 : index
    %c0_0 = arith.constant 0 : index
    %0 = vector.load %arg0[%c0, %c0_0] : memref<2x16xf32, #tpu.memory_space<vmem>>, vector<2x16xf32>
    %c0_1 = arith.constant 0 : index
    %c0_2 = arith.constant 0 : index
    %1 = vector.load %arg1[%c0_1, %c0_2] : memref<16x64xf32, #tpu.memory_space<vmem>>, vector<16x64xf32>
    %cst = arith.constant dense<0.000000e+00> : vector<2x64xf32>
    %2 = tpu.matmul %0, %1, %cst {dimension_numbers = #tpu.dot_dimension_numbers<[1], [0], [0], [1], [0, 0, 1, 1], [], []>} : vector<2x16xf32>, vector<16x64xf32>, vector<2x64xf32> -> vector<2x64xf32>
    %c0_3 = arith.constant 0 : index
    %c0_4 = arith.constant 0 : index
    %3 = vector.load %arg2[%c0_3, %c0_4] : memref<1x64xf32, #tpu.memory_space<vmem>>, vector<1x64xf32>
    %4 = vector.broadcast %3 : vector<1x64xf32> to vector<2x64xf32>
    %5 = arith.addf %2, %4 : vector<2x64xf32>
    %cst_5 = arith.constant 0.000000e+00 : f32
    %6 = vector.broadcast %cst_5 : f32 to vector<2x64xf32>
    %7 = arith.maximumf %5, %6 : vector<2x64xf32>
    %c0_6 = arith.constant 0 : index
    %c0_7 = arith.constant 0 : index
    %8 = vector.load %arg9[%c0_6, %c0_7] : memref<64x32xf32, #tpu.memory_space<vmem>>, vector<64x32xf32>
    %cst_8 = arith.constant dense<0.000000e+00> : vector<2x32xf32>
    %9 = tpu.matmul %7, %8, %cst_8 {dimension_numbers = #tpu.dot_dimension_numbers<[1], [0], [0], [1], [0, 0, 1, 1], [], []>} : vector<2x64xf32>, vector<64x32xf32>, vector<2x32xf32> -> vector<2x32xf32>
    %c0_9 = arith.constant 0 : index
    %c0_10 = arith.constant 0 : index
    %10 = vector.load %arg10[%c0_9, %c0_10] : memref<64x32xf32, #tpu.memory_space<vmem>>, vector<64x32xf32>
    %cst_11 = arith.constant dense<0.000000e+00> : vector<2x32xf32>
    %11 = tpu.matmul %7, %10, %cst_11 {dimension_numbers = #tpu.dot_dimension_numbers<[1], [0], [0], [1], [0, 0, 1, 1], [], []>} : vector<2x64xf32>, vector<64x32xf32>, vector<2x32xf32> -> vector<2x32xf32>
    %12 = arith.maximumf %9, %11 : vector<2x32xf32>
    %c0_12 = arith.constant 0 : index
    %c0_13 = arith.constant 0 : index
    %13 = vector.load %arg3[%c0_12, %c0_13] : memref<32x64xf32, #tpu.memory_space<vmem>>, vector<32x64xf32>
    %cst_14 = arith.constant dense<0.000000e+00> : vector<2x64xf32>
    %14 = tpu.matmul %12, %13, %cst_14 {dimension_numbers = #tpu.dot_dimension_numbers<[1], [0], [0], [1], [0, 0, 1, 1], [], []>} : vector<2x32xf32>, vector<32x64xf32>, vector<2x64xf32> -> vector<2x64xf32>
    %c0_15 = arith.constant 0 : index
    %c0_16 = arith.constant 0 : index
    %15 = vector.load %arg4[%c0_15, %c0_16] : memref<1x64xf32, #tpu.memory_space<vmem>>, vector<1x64xf32>
    %16 = vector.broadcast %15 : vector<1x64xf32> to vector<2x64xf32>
    %17 = arith.addf %14, %16 : vector<2x64xf32>
    %cst_17 = arith.constant 0.000000e+00 : f32
    %18 = vector.broadcast %cst_17 : f32 to vector<2x64xf32>
    %19 = arith.maximumf %17, %18 : vector<2x64xf32>
    %c0_18 = arith.constant 0 : index
    %c0_19 = arith.constant 0 : index
    %20 = vector.load %arg11[%c0_18, %c0_19] : memref<64x32xf32, #tpu.memory_space<vmem>>, vector<64x32xf32>
    %cst_20 = arith.constant dense<0.000000e+00> : vector<2x32xf32>
    %21 = tpu.matmul %19, %20, %cst_20 {dimension_numbers = #tpu.dot_dimension_numbers<[1], [0], [0], [1], [0, 0, 1, 1], [], []>} : vector<2x64xf32>, vector<64x32xf32>, vector<2x32xf32> -> vector<2x32xf32>
    %c0_21 = arith.constant 0 : index
    %c0_22 = arith.constant 0 : index
    %22 = vector.load %arg12[%c0_21, %c0_22] : memref<64x32xf32, #tpu.memory_space<vmem>>, vector<64x32xf32>
    %cst_23 = arith.constant dense<0.000000e+00> : vector<2x32xf32>
    %23 = tpu.matmul %19, %22, %cst_23 {dimension_numbers = #tpu.dot_dimension_numbers<[1], [0], [0], [1], [0, 0, 1, 1], [], []>} : vector<2x64xf32>, vector<64x32xf32>, vector<2x32xf32> -> vector<2x32xf32>
    %24 = arith.maximumf %21, %23 : vector<2x32xf32>
    %c0_24 = arith.constant 0 : index
    %c0_25 = arith.constant 0 : index
    %25 = vector.load %arg5[%c0_24, %c0_25] : memref<32x64xf32, #tpu.memory_space<vmem>>, vector<32x64xf32>
    %cst_26 = arith.constant dense<0.000000e+00> : vector<2x64xf32>
    %26 = tpu.matmul %24, %25, %cst_26 {dimension_numbers = #tpu.dot_dimension_numbers<[1], [0], [0], [1], [0, 0, 1, 1], [], []>} : vector<2x32xf32>, vector<32x64xf32>, vector<2x64xf32> -> vector<2x64xf32>
    %c0_27 = arith.constant 0 : index
    %c0_28 = arith.constant 0 : index
    %27 = vector.load %arg6[%c0_27, %c0_28] : memref<1x64xf32, #tpu.memory_space<vmem>>, vector<1x64xf32>
    %28 = vector.broadcast %27 : vector<1x64xf32> to vector<2x64xf32>
    %29 = arith.addf %26, %28 : vector<2x64xf32>
    %cst_29 = arith.constant 0.000000e+00 : f32
    %30 = vector.broadcast %cst_29 : f32 to vector<2x64xf32>
    %31 = arith.maximumf %29, %30 : vector<2x64xf32>
    %c0_30 = arith.constant 0 : index
    %c0_31 = arith.constant 0 : index
    %32 = vector.load %arg13[%c0_30, %c0_31] : memref<64x32xf32, #tpu.memory_space<vmem>>, vector<64x32xf32>
    %cst_32 = arith.constant dense<0.000000e+00> : vector<2x32xf32>
    %33 = tpu.matmul %31, %32, %cst_32 {dimension_numbers = #tpu.dot_dimension_numbers<[1], [0], [0], [1], [0, 0, 1, 1], [], []>} : vector<2x64xf32>, vector<64x32xf32>, vector<2x32xf32> -> vector<2x32xf32>
    %c0_33 = arith.constant 0 : index
    %c0_34 = arith.constant 0 : index
    %34 = vector.load %arg14[%c0_33, %c0_34] : memref<64x32xf32, #tpu.memory_space<vmem>>, vector<64x32xf32>
    %cst_35 = arith.constant dense<0.000000e+00> : vector<2x32xf32>
    %35 = tpu.matmul %31, %34, %cst_35 {dimension_numbers = #tpu.dot_dimension_numbers<[1], [0], [0], [1], [0, 0, 1, 1], [], []>} : vector<2x64xf32>, vector<64x32xf32>, vector<2x32xf32> -> vector<2x32xf32>
    %36 = arith.maximumf %33, %35 : vector<2x32xf32>
    %c0_36 = arith.constant 0 : index
    %c0_37 = arith.constant 0 : index
    %37 = vector.load %arg7[%c0_36, %c0_37] : memref<32x64xf32, #tpu.memory_space<vmem>>, vector<32x64xf32>
    %cst_38 = arith.constant dense<0.000000e+00> : vector<2x64xf32>
    %38 = tpu.matmul %36, %37, %cst_38 {dimension_numbers = #tpu.dot_dimension_numbers<[1], [0], [0], [1], [0, 0, 1, 1], [], []>} : vector<2x32xf32>, vector<32x64xf32>, vector<2x64xf32> -> vector<2x64xf32>
    %c0_39 = arith.constant 0 : index
    %c0_40 = arith.constant 0 : index
    %39 = vector.load %arg8[%c0_39, %c0_40] : memref<1x64xf32, #tpu.memory_space<vmem>>, vector<1x64xf32>
    %40 = vector.broadcast %39 : vector<1x64xf32> to vector<2x64xf32>
    %41 = arith.addf %38, %40 : vector<2x64xf32>
    %cst_41 = arith.constant 0.000000e+00 : f32
    %42 = vector.broadcast %cst_41 : f32 to vector<2x64xf32>
    %43 = arith.maximumf %41, %42 : vector<2x64xf32>
    %c0_42 = arith.constant 0 : index
    %c0_43 = arith.constant 0 : index
    %44 = vector.load %arg15[%c0_42, %c0_43] : memref<64x32xf32, #tpu.memory_space<vmem>>, vector<64x32xf32>
    %cst_44 = arith.constant dense<0.000000e+00> : vector<2x32xf32>
    %45 = tpu.matmul %7, %44, %cst_44 {dimension_numbers = #tpu.dot_dimension_numbers<[1], [0], [0], [1], [0, 0, 1, 1], [], []>} : vector<2x64xf32>, vector<64x32xf32>, vector<2x32xf32> -> vector<2x32xf32>
    %c0_45 = arith.constant 0 : index
    %c0_46 = arith.constant 0 : index
    %46 = vector.load %arg16[%c0_45, %c0_46] : memref<64x32xf32, #tpu.memory_space<vmem>>, vector<64x32xf32>
    %cst_47 = arith.constant dense<0.000000e+00> : vector<2x32xf32>
    %47 = tpu.matmul %19, %46, %cst_47 {dimension_numbers = #tpu.dot_dimension_numbers<[1], [0], [0], [1], [0, 0, 1, 1], [], []>} : vector<2x64xf32>, vector<64x32xf32>, vector<2x32xf32> -> vector<2x32xf32>
    %48 = arith.addf %45, %47 : vector<2x32xf32>
    %c0_48 = arith.constant 0 : index
    %c0_49 = arith.constant 0 : index
    %49 = vector.load %arg17[%c0_48, %c0_49] : memref<64x32xf32, #tpu.memory_space<vmem>>, vector<64x32xf32>
    %cst_50 = arith.constant dense<0.000000e+00> : vector<2x32xf32>
    %50 = tpu.matmul %31, %49, %cst_50 {dimension_numbers = #tpu.dot_dimension_numbers<[1], [0], [0], [1], [0, 0, 1, 1], [], []>} : vector<2x64xf32>, vector<64x32xf32>, vector<2x32xf32> -> vector<2x32xf32>
    %51 = arith.addf %48, %50 : vector<2x32xf32>
    %c0_51 = arith.constant 0 : index
    %c0_52 = arith.constant 0 : index
    %52 = vector.load %arg18[%c0_51, %c0_52] : memref<64x32xf32, #tpu.memory_space<vmem>>, vector<64x32xf32>
    %cst_53 = arith.constant dense<0.000000e+00> : vector<2x32xf32>
    %53 = tpu.matmul %43, %52, %cst_53 {dimension_numbers = #tpu.dot_dimension_numbers<[1], [0], [0], [1], [0, 0, 1, 1], [], []>} : vector<2x64xf32>, vector<64x32xf32>, vector<2x32xf32> -> vector<2x32xf32>
    %54 = arith.addf %51, %53 : vector<2x32xf32>
    %c0_54 = arith.constant 0 : index
    %c0_55 = arith.constant 0 : index
    %55 = vector.load %arg19[%c0_54, %c0_55] : memref<1x32xf32, #tpu.memory_space<vmem>>, vector<1x32xf32>
    %56 = vector.broadcast %55 : vector<1x32xf32> to vector<2x32xf32>
    %57 = arith.addf %54, %56 : vector<2x32xf32>
    %58 = math.tanh %57 : vector<2x32xf32>
    %c0_56 = arith.constant 0 : index
    %c0_57 = arith.constant 0 : index
    %59 = vector.load %arg43[%c0_56, %c0_57] : memref<2x32xf32, #tpu.memory_space<vmem>>, vector<2x32xf32>
    tpu.vector_store %arg43[%c0_56, %c0_57], %58 {strides = array<i32>} : memref<2x32xf32, #tpu.memory_space<vmem>>, vector<2x32xf32>,
    %c0_58 = arith.constant 0 : index
    %c0_59 = arith.constant 0 : index
    %60 = vector.load %arg20[%c0_58, %c0_59] : memref<32x64xf32, #tpu.memory_space<vmem>>, vector<32x64xf32>
    %cst_60 = arith.constant dense<0.000000e+00> : vector<2x64xf32>
    %61 = tpu.matmul %58, %60, %cst_60 {dimension_numbers = #tpu.dot_dimension_numbers<[1], [0], [0], [1], [0, 0, 1, 1], [], []>} : vector<2x32xf32>, vector<32x64xf32>, vector<2x64xf32> -> vector<2x64xf32>
    %c0_61 = arith.constant 0 : index
    %c0_62 = arith.constant 0 : index
    %62 = vector.load %arg24[%c0_61, %c0_62] : memref<1x64xf32, #tpu.memory_space<vmem>>, vector<1x64xf32>
    %63 = vector.broadcast %62 : vector<1x64xf32> to vector<2x64xf32>
    %64 = arith.addf %61, %63 : vector<2x64xf32>
    %65 = math.tanh %64 : vector<2x64xf32>
    %c0_63 = arith.constant 0 : index
    %c0_64 = arith.constant 0 : index
    %66 = vector.load %arg21[%c0_63, %c0_64] : memref<32x64xf32, #tpu.memory_space<vmem>>, vector<32x64xf32>
    %cst_65 = arith.constant dense<0.000000e+00> : vector<2x64xf32>
    %67 = tpu.matmul %58, %66, %cst_65 {dimension_numbers = #tpu.dot_dimension_numbers<[1], [0], [0], [1], [0, 0, 1, 1], [], []>} : vector<2x32xf32>, vector<32x64xf32>, vector<2x64xf32> -> vector<2x64xf32>
    %c0_66 = arith.constant 0 : index
    %c0_67 = arith.constant 0 : index
    %68 = vector.load %arg25[%c0_66, %c0_67] : memref<1x64xf32, #tpu.memory_space<vmem>>, vector<1x64xf32>
    %69 = vector.broadcast %68 : vector<1x64xf32> to vector<2x64xf32>
    %70 = arith.addf %67, %69 : vector<2x64xf32>
    %71 = math.tanh %70 : vector<2x64xf32>
    %c0_68 = arith.constant 0 : index
    %c0_69 = arith.constant 0 : index
    %72 = vector.load %arg22[%c0_68, %c0_69] : memref<32x64xf32, #tpu.memory_space<vmem>>, vector<32x64xf32>
    %cst_70 = arith.constant dense<0.000000e+00> : vector<2x64xf32>
    %73 = tpu.matmul %58, %72, %cst_70 {dimension_numbers = #tpu.dot_dimension_numbers<[1], [0], [0], [1], [0, 0, 1, 1], [], []>} : vector<2x32xf32>, vector<32x64xf32>, vector<2x64xf32> -> vector<2x64xf32>
    %c0_71 = arith.constant 0 : index
    %c0_72 = arith.constant 0 : index
    %74 = vector.load %arg26[%c0_71, %c0_72] : memref<1x64xf32, #tpu.memory_space<vmem>>, vector<1x64xf32>
    %75 = vector.broadcast %74 : vector<1x64xf32> to vector<2x64xf32>
    %76 = arith.addf %73, %75 : vector<2x64xf32>
    %77 = math.tanh %76 : vector<2x64xf32>
    %c0_73 = arith.constant 0 : index
    %c0_74 = arith.constant 0 : index
    %78 = vector.load %arg23[%c0_73, %c0_74] : memref<32x64xf32, #tpu.memory_space<vmem>>, vector<32x64xf32>
    %cst_75 = arith.constant dense<0.000000e+00> : vector<2x64xf32>
    %79 = tpu.matmul %58, %78, %cst_75 {dimension_numbers = #tpu.dot_dimension_numbers<[1], [0], [0], [1], [0, 0, 1, 1], [], []>} : vector<2x32xf32>, vector<32x64xf32>, vector<2x64xf32> -> vector<2x64xf32>
    %c0_76 = arith.constant 0 : index
    %c0_77 = arith.constant 0 : index
    %80 = vector.load %arg27[%c0_76, %c0_77] : memref<1x64xf32, #tpu.memory_space<vmem>>, vector<1x64xf32>
    %81 = vector.broadcast %80 : vector<1x64xf32> to vector<2x64xf32>
    %82 = arith.addf %79, %81 : vector<2x64xf32>
    %83 = math.tanh %82 : vector<2x64xf32>
    %c0_78 = arith.constant 0 : index
    %c0_79 = arith.constant 0 : index
    %84 = vector.load %arg28[%c0_78, %c0_79] : memref<64x32xf32, #tpu.memory_space<vmem>>, vector<64x32xf32>
    %cst_80 = arith.constant dense<0.000000e+00> : vector<2x32xf32>
    %85 = tpu.matmul %83, %84, %cst_80 {dimension_numbers = #tpu.dot_dimension_numbers<[1], [0], [0], [1], [0, 0, 1, 1], [], []>} : vector<2x64xf32>, vector<64x32xf32>, vector<2x32xf32> -> vector<2x32xf32>
    %c0_81 = arith.constant 0 : index
    %c0_82 = arith.constant 0 : index
    %86 = vector.load %arg29[%c0_81, %c0_82] : memref<1x32xf32, #tpu.memory_space<vmem>>, vector<1x32xf32>
    %87 = vector.broadcast %86 : vector<1x32xf32> to vector<2x32xf32>
    %88 = arith.addf %85, %87 : vector<2x32xf32>
    %89 = math.tanh %88 : vector<2x32xf32>
    %c0_83 = arith.constant 0 : index
    %c0_84 = arith.constant 0 : index
    %90 = vector.load %arg30[%c0_83, %c0_84] : memref<32x64xf32, #tpu.memory_space<vmem>>, vector<32x64xf32>
    %cst_85 = arith.constant dense<0.000000e+00> : vector<2x64xf32>
    %91 = tpu.matmul %89, %90, %cst_85 {dimension_numbers = #tpu.dot_dimension_numbers<[1], [0], [0], [1], [0, 0, 1, 1], [], []>} : vector<2x32xf32>, vector<32x64xf32>, vector<2x64xf32> -> vector<2x64xf32>
    %c0_86 = arith.constant 0 : index
    %c0_87 = arith.constant 0 : index
    %92 = vector.load %arg31[%c0_86, %c0_87] : memref<64x32xf32, #tpu.memory_space<vmem>>, vector<64x32xf32>
    %cst_88 = arith.constant dense<0.000000e+00> : vector<2x32xf32>
    %93 = tpu.matmul %91, %92, %cst_88 {dimension_numbers = #tpu.dot_dimension_numbers<[1], [0], [0], [1], [0, 0, 1, 1], [], []>} : vector<2x64xf32>, vector<64x32xf32>, vector<2x32xf32> -> vector<2x32xf32>
    %c0_89 = arith.constant 0 : index
    %c0_90 = arith.constant 0 : index
    %94 = vector.load %arg32[%c0_89, %c0_90] : memref<64x32xf32, #tpu.memory_space<vmem>>, vector<64x32xf32>
    %cst_91 = arith.constant dense<0.000000e+00> : vector<2x32xf32>
    %95 = tpu.matmul %77, %94, %cst_91 {dimension_numbers = #tpu.dot_dimension_numbers<[1], [0], [0], [1], [0, 0, 1, 1], [], []>} : vector<2x64xf32>, vector<64x32xf32>, vector<2x32xf32> -> vector<2x32xf32>
    %96 = arith.addf %93, %95 : vector<2x32xf32>
    %c0_92 = arith.constant 0 : index
    %c0_93 = arith.constant 0 : index
    %97 = vector.load %arg33[%c0_92, %c0_93] : memref<1x32xf32, #tpu.memory_space<vmem>>, vector<1x32xf32>
    %98 = vector.broadcast %97 : vector<1x32xf32> to vector<2x32xf32>
    %99 = arith.addf %96, %98 : vector<2x32xf32>
    %100 = math.tanh %99 : vector<2x32xf32>
    %c0_94 = arith.constant 0 : index
    %c0_95 = arith.constant 0 : index
    %101 = vector.load %arg34[%c0_94, %c0_95] : memref<32x64xf32, #tpu.memory_space<vmem>>, vector<32x64xf32>
    %cst_96 = arith.constant dense<0.000000e+00> : vector<2x64xf32>
    %102 = tpu.matmul %100, %101, %cst_96 {dimension_numbers = #tpu.dot_dimension_numbers<[1], [0], [0], [1], [0, 0, 1, 1], [], []>} : vector<2x32xf32>, vector<32x64xf32>, vector<2x64xf32> -> vector<2x64xf32>
    %c0_97 = arith.constant 0 : index
    %c0_98 = arith.constant 0 : index
    %103 = vector.load %arg35[%c0_97, %c0_98] : memref<64x32xf32, #tpu.memory_space<vmem>>, vector<64x32xf32>
    %cst_99 = arith.constant dense<0.000000e+00> : vector<2x32xf32>
    %104 = tpu.matmul %102, %103, %cst_99 {dimension_numbers = #tpu.dot_dimension_numbers<[1], [0], [0], [1], [0, 0, 1, 1], [], []>} : vector<2x64xf32>, vector<64x32xf32>, vector<2x32xf32> -> vector<2x32xf32>
    %c0_100 = arith.constant 0 : index
    %c0_101 = arith.constant 0 : index
    %105 = vector.load %arg36[%c0_100, %c0_101] : memref<64x32xf32, #tpu.memory_space<vmem>>, vector<64x32xf32>
    %cst_102 = arith.constant dense<0.000000e+00> : vector<2x32xf32>
    %106 = tpu.matmul %71, %105, %cst_102 {dimension_numbers = #tpu.dot_dimension_numbers<[1], [0], [0], [1], [0, 0, 1, 1], [], []>} : vector<2x64xf32>, vector<64x32xf32>, vector<2x32xf32> -> vector<2x32xf32>
    %107 = arith.addf %104, %106 : vector<2x32xf32>
    %c0_103 = arith.constant 0 : index
    %c0_104 = arith.constant 0 : index
    %108 = vector.load %arg37[%c0_103, %c0_104] : memref<1x32xf32, #tpu.memory_space<vmem>>, vector<1x32xf32>
    %109 = vector.broadcast %108 : vector<1x32xf32> to vector<2x32xf32>
    %110 = arith.addf %107, %109 : vector<2x32xf32>
    %111 = math.tanh %110 : vector<2x32xf32>
    %c0_105 = arith.constant 0 : index
    %c0_106 = arith.constant 0 : index
    %112 = vector.load %arg38[%c0_105, %c0_106] : memref<32x64xf32, #tpu.memory_space<vmem>>, vector<32x64xf32>
    %cst_107 = arith.constant dense<0.000000e+00> : vector<2x64xf32>
    %113 = tpu.matmul %111, %112, %cst_107 {dimension_numbers = #tpu.dot_dimension_numbers<[1], [0], [0], [1], [0, 0, 1, 1], [], []>} : vector<2x32xf32>, vector<32x64xf32>, vector<2x64xf32> -> vector<2x64xf32>
    %c0_108 = arith.constant 0 : index
    %c0_109 = arith.constant 0 : index
    %114 = vector.load %arg39[%c0_108, %c0_109] : memref<64x16xf32, #tpu.memory_space<vmem>>, vector<64x16xf32>
    %cst_110 = arith.constant dense<0.000000e+00> : vector<2x16xf32>
    %115 = tpu.matmul %113, %114, %cst_110 {dimension_numbers = #tpu.dot_dimension_numbers<[1], [0], [0], [1], [0, 0, 1, 1], [], []>} : vector<2x64xf32>, vector<64x16xf32>, vector<2x16xf32> -> vector<2x16xf32>
    %c0_111 = arith.constant 0 : index
    %c0_112 = arith.constant 0 : index
    %116 = vector.load %arg40[%c0_111, %c0_112] : memref<64x16xf32, #tpu.memory_space<vmem>>, vector<64x16xf32>
    %cst_113 = arith.constant dense<0.000000e+00> : vector<2x16xf32>
    %117 = tpu.matmul %65, %116, %cst_113 {dimension_numbers = #tpu.dot_dimension_numbers<[1], [0], [0], [1], [0, 0, 1, 1], [], []>} : vector<2x64xf32>, vector<64x16xf32>, vector<2x16xf32> -> vector<2x16xf32>
    %118 = arith.addf %115, %117 : vector<2x16xf32>
    %c0_114 = arith.constant 0 : index
    %c0_115 = arith.constant 0 : index
    %119 = vector.load %arg41[%c0_114, %c0_115] : memref<1x16xf32, #tpu.memory_space<vmem>>, vector<1x16xf32>
    %120 = vector.broadcast %119 : vector<1x16xf32> to vector<2x16xf32>
    %121 = arith.addf %118, %120 : vector<2x16xf32>
    %122 = math.tanh %121 : vector<2x16xf32>
    %c0_116 = arith.constant 0 : index
    %c0_117 = arith.constant 0 : index
    %123 = vector.load %arg42[%c0_116, %c0_117] : memref<2x16xf32, #tpu.memory_space<vmem>>, vector<2x16xf32>
    tpu.vector_store %arg42[%c0_116, %c0_117], %122 {strides = array<i32>} : memref<2x16xf32, #tpu.memory_space<vmem>>, vector<2x16xf32>,
    return
  }
}

</mosaic_0001>

<bundles_post_ra>
// kernel: _forward.1
= control target key start
LH: loop header
LB: loop body
LE: loop exit
PB: predicated region body
PF: predicated region fallthrough
CT: control target
= control target key end

     0   :  { %s3634_s6 = smov 1   ;;  %s3635_s10 = smov 2   ;;  %s4295_s0 = inlined_call_operand.smem [shape: u32[44], index: -1, kind: input, shape index: {}] }
   0x1   :  { %s3690_s5 = sld [smem:[%s4295_s0]]   ;;  %s3636_s14 = smov 3  }
   0x2   :  { %s3695_s9 = sld [smem:[%s4295_s0 + %s3634_s6]]   ;;  %s3637_s18 = smov 4  }
   0x3   :  { %s3700_s13 = sld [smem:[%s4295_s0 + %s3635_s10]]   ;;  %s3638_s22 = smov 5  }
   0x4   :  { %s3705_s17 = sld [smem:[%s4295_s0 + %s3636_s14]]   ;;  %s3639_s26 = smov 6  }
   0x5   :  { %s3710_s21 = sld [smem:[%s4295_s0 + %s3637_s18]]   ;;  %s3640_s30 = smov 7  }
   0x6   :  { %s3715_s25 = sld [smem:[%s4295_s0 + %s3638_s22]]   ;;  %s3641_s4 = smov 8  }
   0x7   :  { %s3720_s29 = sld [smem:[%s4295_s0 + %s3639_s26]]   ;;  %s3642_s10 = smov 9  }
   0x8   :  { %s3725_s3 = sld [smem:[%s4295_s0 + %s3640_s30]]   ;;  %s3643_s15 = smov 10  }
   0x9   :  { %s3730_s8 = sld [smem:[%s4295_s0 + %s3641_s4]]   ;;  %s3644_s20 = smov 11  }
   0xa   :  { %s3735_s14 = sld [smem:[%s4295_s0 + %s3642_s10]]   ;;  %s3645_s26 = smov 12  }
   0xb   :  { %s3740_s19 = sld [smem:[%s4295_s0 + %s3643_s15]]   ;;  %s3646_s1 = smov 13  }
   0xc   :  { %s3745_s24 = sld [smem:[%s4295_s0 + %s3644_s20]]   ;;  %s3647_s7 = smov 14  }
   0xd   :  { %s3750_s30 = sld [smem:[%s4295_s0 + %s3645_s26]]   ;;  %s3648_s15 = smov 15  }
   0xe   :  { %4313 = sst [smem:[#allocation8_spill]] %s3725_s3  ;;  %s3649_s22 = smov 16  }
   0xf   :  { %4314 = sst [smem:[#allocation9_spill]] %s3730_s8  ;;  %s3650_s28 = smov 17  }
  0x10   :  { %s3755_s6 = sld [smem:[%s4295_s0 + %s3646_s1]]  }
  0x11   :  { %s3760_s12 = sld [smem:[%s4295_s0 + %s3647_s7]]   ;;  %s3651_s7 = smov 18  }
  0x12   :  { %s3765_s20 = sld [smem:[%s4295_s0 + %s3648_s15]]   ;;  %s3652_s15 = smov 19  }
  0x13   :  { %s3770_s27 = sld [smem:[%s4295_s0 + %s3649_s22]]   ;;  %s3653_s22 = smov 20  }
  0x14   :  { %s3775_s4 = sld [smem:[%s4295_s0 + %s3650_s28]]   ;;  %s3654_s28 = smov 21  }
  0x15   :  { %s3780_s8 = sld [smem:[%s4295_s0 + %s3651_s7]]   ;;  %s3655_s7 = smov 22  }
  0x16   :  { %s3790_s3 = sld [smem:[%s4295_s0 + %s3653_s22]]   ;;  %s3657_s22 = smov 24  }
  0x18   :  { %4315 = sst [smem:[#allocation10_spill]] %s3765_s20 }
  0x19   :  { %s3785_s20 = sld [smem:[%s4295_s0 + %s3652_s15]]   ;;  %s3656_s15 = smov 23  }
  0x1a   :  { %4316 = sst [smem:[#allocation11_spill]] %s3775_s4 }
  0x1b   :  { %4317 = sst [smem:[#allocation12_spill]] %s3780_s8 }
  0x1c   :  { %4319 = sst [smem:[#allocation14_spill]] %s3790_s3 }
  0x1d   :  { %s3795_s4 = sld [smem:[%s4295_s0 + %s3654_s28]]   ;;  %s3658_s28 = smov 25  }
  0x1e   :  { %s3800_s8 = sld [smem:[%s4295_s0 + %s3655_s7]]   ;;  %s3659_s7 = smov 26  }
  0x1f   :  { %4318 = sst [smem:[#allocation13_spill]] %s3785_s20 }
  0x20   :  { %s3805_s20 = sld [smem:[%s4295_s0 + %s3656_s15]]   ;;  %s3660_s15 = smov 27  }
  0x21   :  { %s3810_s3 = sld [smem:[%s4295_s0 + %s3657_s22]]   ;;  %s3661_s22 = smov 28  }
  0x23   :  { %4320 = sst [smem:[#allocation15_spill]] %s3795_s4 }
  0x24   :  { %4321 = sst [smem:[#allocation16_spill]] %s3800_s8 }
  0x25   :  { %s3815_s4 = sld [smem:[%s4295_s0 + %s3658_s28]]   ;;  %s3662_s28 = smov 29  }
  0x26   :  { %4322 = sst [smem:[#allocation17_spill]] %s3805_s20 }
  0x27   :  { %4323 = sst [smem:[#allocation18_spill]] %s3810_s3 }
  0x28   :  { %s3820_s8 = sld [smem:[%s4295_s0 + %s3659_s7]]   ;;  %s3663_s7 = smov 30  }
  0x29   :  { %s3825_s20 = sld [smem:[%s4295_s0 + %s3660_s15]]   ;;  %s3664_s15 = smov 31  }
  0x2a   :  { %s3830_s3 = sld [smem:[%s4295_s0 + %s3661_s22]]   ;;  %s3665_s22 = smov 32  }
  0x2b   :  { %4324 = sst [smem:[#allocation19_spill]] %s3815_s4 }
  0x2c   :  { %s3835_s4 = sld [smem:[%s4295_s0 + %s3662_s28]]   ;;  %s3666_s28 = smov 33  }
  0x2e   :  { %4325 = sst [smem:[#allocation20_spill]] %s3820_s8 }
  0x2f   :  { %4326 = sst [smem:[#allocation21_spill]] %s3825_s20 }
  0x30   :  { %4327 = sst [smem:[#allocation22_spill]] %s3830_s3 }
  0x31   :  { %s3840_s8 = sld [smem:[%s4295_s0 + %s3663_s7]]   ;;  %s3667_s7 = smov 34  }
  0x32   :  { %4328 = sst [smem:[#allocation23_spill]] %s3835_s4 }
  0x33   :  { %s3845_s20 = sld [smem:[%s4295_s0 + %s3664_s15]]   ;;  %s3668_s15 = smov 35  }
  0x34   :  { %s3850_s3 = sld [smem:[%s4295_s0 + %s3665_s22]]   ;;  %s3669_s22 = smov 36  }
  0x35   :  { %s3855_s4 = sld [smem:[%s4295_s0 + %s3666_s28]]   ;;  %s3670_s28 = smov 37  }
  0x37   :  { %4329 = sst [smem:[#allocation24_spill]] %s3840_s8 }
  0x38   :  { %s3860_s8 = sld [smem:[%s4295_s0 + %s3667_s7]]   ;;  %s3671_s7 = smov 38  }
  0x39   :  { %4330 = sst [smem:[#allocation25_spill]] %s3845_s20 }
  0x3a   :  { %4331 = sst [smem:[#allocation26_spill]] %s3850_s3 }
  0x3b   :  { %4332 = sst [smem:[#allocation27_spill]] %s3855_s4 }
  0x3c   :  { %s3865_s20 = sld [smem:[%s4295_s0 + %s3668_s15]]   ;;  %s3672_s15 = smov 39  }
  0x3d   :  { %s3870_s3 = sld [smem:[%s4295_s0 + %s3669_s22]]   ;;  %s3673_s22 = smov 40  }
  0x3e   :  { %4333 = sst [smem:[#allocation28_spill]] %s3860_s8 }
  0x3f   :  { %s3875_s4 = sld [smem:[%s4295_s0 + %s3670_s28]]   ;;  %s3674_s28 = smov 41  }
  0x40   :  { %s3880_s8 = sld [smem:[%s4295_s0 + %s3671_s7]]   ;;  %s3675_s7 = smov 42  }
  0x42   :  { %4334 = sst [smem:[#allocation29_spill]] %s3865_s20 }
  0x43   :  { %4335 = sst [smem:[#allocation30_spill]] %s3870_s3 }
  0x44   :  { %s3885_s20 = sld [smem:[%s4295_s0 + %s3672_s15]]   ;;  %s3676_s15 = smov 43  }
  0x45   :  { %4336 = sst [smem:[#allocation31_spill]] %s3875_s4 }
  0x46   :  { %4337 = sst [smem:[#allocation32_spill]] %s3880_s8 }
  0x47   :  { %s3890_s3 = sld [smem:[%s4295_s0 + %s3673_s22]]  }
  0x48   :  { %s3895_s4 = sld [smem:[%s4295_s0 + %s3674_s28]]  }
  0x49   :  { %s3900_s8 = sld [smem:[%s4295_s0 + %s3675_s7]]  }
  0x4a   :  { %4338 = sst [smem:[#allocation33_spill]] %s3885_s20 }
  0x4b   :  { %s3905_s20 = sld [smem:[%s4295_s0 + %s3676_s15]]  }
  0x4c   :  { %93 = vsyncpa [#allocation3], 0  ;;  %v180_v0 = vld [vmem:[%s3695_s9] sm:$0xff]  ;;  %v181_v1 = vld [vmem:[%s3695_s9 + $0x8] sm:$0xff]  ;;  %v3677_v2 = vmov 0.0|0.0   ;;  %vm3678_vm0 = vmmov 0  }
  0x4d   :  { %3253 = vmatprep.subr.bf16.mxu0 %v3677_v2  ;;  %v3254_v3 = vpack.c.bf16 %v181_v1, %v180_v0  ;;  %v3679_v4 = vmov 0.0   ;;  %v264_v5 = vld [vmem:[%s3735_s14] sm:$0xff]  ;;  %v265_v6 = vld [vmem:[%s3735_s14 + $0x8] sm:$0xff]  ;;  %3256 = vmatprep.subr.bf16.mxu1 %v3677_v2  ;;  %v266_v10 = vld [vmem:[%s3735_s14 + $0x10] sm:$0xff]  ;;  %vm189_vm1 = vcmask 130048  }
  0x4e   :  { %2817 = vmatprep.mubr.msk.f32.mxu0 %vm3678_vm0, %v3679_v4  ;;  %v3257_v7 = vpack.c.bf16 %v265_v6, %v264_v5  ;;  %v346_v8 = vld [vmem:[%s3740_s19] sm:$0xff]  ;;  %v347_v9 = vld [vmem:[%s3740_s19 + $0x8] sm:$0xff]  ;;  %2836 = vmatprep.mubr.msk.f32.mxu1 %vm3678_vm0, %v3679_v4  ;;  %v267_v13 = vld [vmem:[%s3735_s14 + $0x18] sm:$0xff] }
  0x4f   :  { %3255 = vmatpush3.bf16.msra.mxu0 %v3254_v3  ;;  %v179_v11 = vld [vmem:[%s3690_s5] sm:$0x3]  ;;  %v3269_v12 = vpack.c.bf16 %v347_v9, %v346_v8  ;;  %v3260_v14 = vpack.c.bf16 %v267_v13, %v266_v10  ;;  %v348_v15 = vld [vmem:[%s3740_s19 + $0x10] sm:$0xff]  ;;  %v349_v16 = vld [vmem:[%s3740_s19 + $0x18] sm:$0xff] }
  0x50   :  { %3268 = vmatprep.subr.bf16.mxu0 %v3677_v2  ;;  %3258 = vmatpush3.bf16.msra.mxu1 %v3257_v7  ;;  %v268_v17 = vld [vmem:[%s3735_s14 + $0x20] sm:$0xff]  ;;  %v269_v18 = vld [vmem:[%s3735_s14 + $0x28] sm:$0xff] }
  0x51   :  { %3259 = vmatprep.subr.bf16.mxu1 %v3677_v2 }
  0x52   :  { %94 = vsyncpa [#allocation5], 0  ;;  %2818 = vmatmul.mubr.msk.f32.vlgmr.msra.gmra.mrb[0].mxu0 %vm189_vm1, %v179_v11  ;;  %v3272_v19 = vpack.c.bf16 %v349_v16, %v348_v15  ;;  %v3263_v20 = vpack.c.bf16 %v269_v18, %v268_v17  ;;  %v350_v21 = vld [vmem:[%s3740_s19 + $0x20] sm:$0xff]  ;;  %v351_v22 = vld [vmem:[%s3740_s19 + $0x28] sm:$0xff]  ;;  %vm272_vm2 = vcmask 523264   ;;  %vm436_vm3 = vcmask 261120  }
  0x53   :  { %3270 = vmatpush3.bf16.msra.mxu0 %v3269_v12  ;;  %2855 = vmatprep.mubr.msk.f32.mxu0 %vm3678_vm0, %v3679_v4  ;;  %v3275_v23 = vpack.c.bf16 %v351_v22, %v350_v21  ;;  %v270_v24 = vld [vmem:[%s3735_s14 + $0x30] sm:$0xff]  ;;  %v271_v25 = vld [vmem:[%s3735_s14 + $0x38] sm:$0xff]  ;;  %v2566_v30 = vld [vmem:[%s3700_s13] ss:$0 sm:$0xff]  ;;  %s4339_s0 = sld [smem:[#allocation8_spill]]  ;;  %s4340_s5 = sld [smem:[#allocation11_spill]] }
  0x54   :  { %3271 = vmatprep.subr.bf16.mxu0 %v3677_v2  ;;  %3261 = vmatpush3.bf16.msra.mxu1 %v3260_v14  ;;  %v352_v26 = vld [vmem:[%s3740_s19 + $0x30] sm:$0xff]  ;;  %v3266_v27 = vpack.c.bf16 %v271_v25, %v270_v24  ;;  %v353_v28 = vld [vmem:[%s3740_s19 + $0x38] sm:$0xff]  ;;  %v425_v31 = vld [vmem:[%s3705_s17] sm:$0xff]  ;;  %s4341_s9 = sld [smem:[#allocation10_spill]]  ;;  %s4342_s13 = sld [smem:[#allocation12_spill]]  ;;  %vm1327_vm4 = vcmask 254976  }
  0x55   :  { %3262 = vmatprep.subr.bf16.mxu1 %v3677_v2  ;;  %v3278_v29 = vpack.c.bf16 %v353_v28, %v352_v26  ;;  %v426_v32 = vld [vmem:[%s3705_s17 + $0x8] sm:$0xff]  ;;  %v427_v38 = vld [vmem:[%s3705_s17 + $0x10] sm:$0xff]  ;;  %v428_v39 = vld [vmem:[%s3705_s17 + $0x18] sm:$0xff]  ;;  %s4343_s17 = sld [smem:[#allocation9_spill]]  ;;  %s4347_s14 = sld [smem:[#allocation16_spill]] }
  0x56   :  { %v3281_v36 = vpack.c.bf16 %v426_v32, %v425_v31  ;;  %v3284_v40 = vpack.c.bf16 %v428_v39, %v427_v38  ;;  %v511_v41 = vld [vmem:[%s3745_s24] sm:$0xff]  ;;  %v512_v42 = vld [vmem:[%s3745_s24 + $0x8] sm:$0xff]  ;;  %v513_v44 = vld [vmem:[%s3745_s24 + $0x10] sm:$0xff]  ;;  %s4348_s19 = sld [smem:[#allocation17_spill]]  ;;  %s4354_s22 = sld [smem:[#allocation26_spill]] }
  0x57   :  { %3273 = vmatpush3.bf16.msra.mxu0 %v3272_v19  ;;  %v3287_v43 = vpack.c.bf16 %v512_v42, %v511_v41  ;;  %v514_v45 = vld [vmem:[%s3745_s24 + $0x18] sm:$0xff]  ;;  %v515_v47 = vld [vmem:[%s3745_s24 + $0x20] sm:$0xff]  ;;  %v516_v48 = vld [vmem:[%s3745_s24 + $0x28] sm:$0xff]  ;;  %s4355_s23 = sld [smem:[#allocation20_spill]]  ;;  %s4356_s26 = sld [smem:[#allocation30_spill]] }
  0x58   :  { %3274 = vmatprep.subr.bf16.mxu0 %v3677_v2  ;;  %3264 = vmatpush3.bf16.msra.mxu1 %v3263_v20  ;;  %v3290_v46 = vpack.c.bf16 %v514_v45, %v513_v44  ;;  %v3293_v49 = vpack.c.bf16 %v516_v48, %v515_v47  ;;  %v592_v50 = vld [vmem:[%s3750_s30] sm:$0xff]  ;;  %v593_v51 = vld [vmem:[%s3750_s30 + $0x8] sm:$0xff]  ;;  %v594_v58 = vld [vmem:[%s3750_s30 + $0x10] sm:$0xff]  ;;  %s4357_s28 = sld [smem:[#allocation19_spill]]  ;;  %s4358_s1 = sld [smem:[#allocation28_spill]] }
  0x59   :  { %3265 = vmatprep.subr.bf16.mxu1 %v3677_v2  ;;  %v3299_v54 = vpack.c.bf16 %v593_v51, %v592_v50  ;;  %v595_v59 = vld [vmem:[%s3750_s30 + $0x18] sm:$0xff]  ;;  %v596_v61 = vld [vmem:[%s3750_s30 + $0x20] sm:$0xff]  ;;  %v597_v62 = vld [vmem:[%s3750_s30 + $0x28] sm:$0xff]  ;;  %s4359_s2 = sld [smem:[#allocation27_spill]]  ;;  %s4360_s7 = sld [smem:[#allocation29_spill]] }
  0x5a   :  { %v3302_v60 = vpack.c.bf16 %v595_v59, %v594_v58  ;;  %v3305_v63 = vpack.c.bf16 %v597_v62, %v596_v61  ;;  %v517_v0 = vld [vmem:[%s3745_s24 + $0x30] sm:$0xff]  ;;  %v518_v1 = vld [vmem:[%s3745_s24 + $0x38] sm:$0xff]  ;;  %v2570_v8 = vld [vmem:[%s3710_s21] ss:$0 sm:$0xff]  ;;  %s4344_s21 = sld [smem:[#allocation14_spill]]  ;;  %s4361_s10 = sld [smem:[#allocation18_spill]] }
  0x5b   :  { %3276 = vmatpush3.bf16.msra.mxu0 %v3275_v23  ;;  %v598_v3 = vld [vmem:[%s3750_s30 + $0x30] sm:$0xff]  ;;  %v3296_v5 = vpack.c.bf16 %v518_v1, %v517_v0  ;;  %v599_v6 = vld [vmem:[%s3750_s30 + $0x38] sm:$0xff]  ;;  %v671_v9 = vld [vmem:[%s3715_s25] sm:$0xff]  ;;  %s4349_s24 = sld [smem:[#allocation22_spill]]  ;;  %s4350_s30 = sld [smem:[#allocation21_spill]] }
  0x5c   :  { %3277 = vmatprep.subr.bf16.mxu0 %v3677_v2  ;;  %3267 = vmatpush3.bf16.msra.mxu1 %v3266_v27  ;;  %v3308_v7 = vpack.c.bf16 %v599_v6, %v598_v3  ;;  %v672_v10 = vld [vmem:[%s3715_s25 + $0x8] sm:$0xff]  ;;  %v673_v16 = vld [vmem:[%s3715_s25 + $0x10] sm:$0xff]  ;;  %v674_v17 = vld [vmem:[%s3715_s25 + $0x18] sm:$0xff]  ;;  %s4345_s25 = sld [smem:[#allocation15_spill]]  ;;  %s4362_s11 = sld [smem:[#allocation32_spill]] }
  0x5d   :  { %3280 = vmatprep.subr.bf16.mxu1 %v3677_v2  ;;  %v3311_v14 = vpack.c.bf16 %v672_v10, %v671_v9  ;;  %v3314_v18 = vpack.c.bf16 %v674_v17, %v673_v16  ;;  %v756_v19 = vld [vmem:[%s3755_s6] sm:$0xff]  ;;  %v757_v20 = vld [vmem:[%s3755_s6 + $0x8] sm:$0xff]  ;;  %v758_v22 = vld [vmem:[%s3755_s6 + $0x10] sm:$0xff]  ;;  %s4363_s15 = sld [smem:[#allocation31_spill]]  ;;  %s4364_s16 = sld [smem:[#allocation33_spill]] }
  0x5e   :  { %v3317_v21 = vpack.c.bf16 %v757_v20, %v756_v19  ;;  %v759_v23 = vld [vmem:[%s3755_s6 + $0x18] sm:$0xff]  ;;  %v760_v25 = vld [vmem:[%s3755_s6 + $0x20] sm:$0xff]  ;;  %v761_v26 = vld [vmem:[%s3755_s6 + $0x28] sm:$0xff] }
  0x5f   :  { %3279 = vmatpush3.bf16.msra.mxu0 %v3278_v29  ;;  %v3320_v24 = vpack.c.bf16 %v759_v23, %v758_v22  ;;  %v3323_v27 = vpack.c.bf16 %v761_v26, %v760_v25  ;;  %v837_v28 = vld [vmem:[%s3760_s12] sm:$0xff]  ;;  %v838_v29 = vld [vmem:[%s3760_s12 + $0x8] sm:$0xff]  ;;  %v840_v38 = vld [vmem:[%s3760_s12 + $0x18] sm:$0xff] }
  0x60   :  { %3286 = vmatprep.subr.bf16.mxu0 %v3677_v2  ;;  %v3329_v32 = vpack.c.bf16 %v838_v29, %v837_v28  ;;  %v842_v41 = vld [vmem:[%s3760_s12 + $0x28] sm:$0xff]  ;;  %v844_v44 = vld [vmem:[%s3760_s12 + $0x38] sm:$0xff]  ;;  %v1009_v50 = vld [vmem:[%s3770_s27] sm:$0xff] }
  0x61   :  { %v763_v47 = vld [vmem:[%s3755_s6 + $0x38] sm:$0xff]  ;;  %v1010_v51 = vld [vmem:[%s3770_s27 + $0x8] sm:$0xff]  ;;  %v1011_v59 = vld [vmem:[%s3770_s27 + $0x10] sm:$0xff] }
  0x62   :  { %v918_v62 = vld [vmem:[%s4339_s0 + $0x10] sm:$0xff]  ;;  %v1013_v1 = vld [vmem:[%s3770_s27 + $0x20] sm:$0xff]  ;;  %v1014_v3 = vld [vmem:[%s3770_s27 + $0x28] sm:$0xff] }
  0x63   :  { %v3353_v6 = vpack.c.bf16 %v1014_v3, %v1013_v1  ;;  %v1157_v10 = vld [vmem:[%s4340_s5] sm:$0xff]  ;;  %v1163_v20 = vld [vmem:[%s4340_s5 + $0x30] sm:$0xff]  ;;  %v1002_v23 = vld [vmem:[%s4341_s9 + $0x8] sm:$0xff] }
  0x64   :  { %v1161_v17 = vld [vmem:[%s4340_s5 + $0x20] sm:$0xff]  ;;  %v1330_v1 = vld [vmem:[%s4344_s21 + $0x8] sm:$0xff] }
  0x65   :  { %v1001_v22 = vld [vmem:[%s4341_s9] sm:$0xff] }
  0x66   :  { %v3359_v26 = vpack.c.bf16 %v1002_v23, %v1001_v22  ;;  %v1414_v3 = vld [vmem:[%s4345_s25] sm:$0xff]  ;;  %v1579_v22 = vld [vmem:[%s4348_s19 + $0x8] sm:$0xff] }
 0x125   :  { %v259_v33 = vpop.f32.mrb[0].mxu0 }
 0x126   :  { %v260_v34 = vadd.f32 %v2566_v30, %v259_v33  ;;  %v2819_v35 = vpop.f32.mrb[1].mxu0 }
 0x128   :  { %v3946_v37 = vmax.f32 %v260_v34, 0.0 }
 0x12a   :  { %2837 = vmatmul.mubr.msk.f32.vlgmr.msra.gmra.mrb[0].mxu1 %vm272_vm2, %v3946_v37  ;;  %2856 = vmatmul.mubr.msk.f32.vlgmr.msra.gmra.mrb[2].mxu0 %vm272_vm2, %v3946_v37 }
 0x12b   :  { %3282 = vmatpush3.bf16.msra.mxu1 %v3281_v36  ;;  %2866 = vmatprep.mubr.msk.f32.mxu1 %vm3678_vm0, %v3679_v4  ;;  %v839_v36 = vld [vmem:[%s3760_s12 + $0x10] sm:$0xff] }
 0x12c   :  { %3283 = vmatprep.subr.bf16.mxu1 %v3677_v2  ;;  %2885 = vmatprep.mubr.msk.f32.mxu0 %vm3678_vm0, %v3679_v4  ;;  %v3332_v39 = vpack.c.bf16 %v840_v38, %v839_v36  ;;  %v1007_v36 = vld [vmem:[%s4341_s9 + $0x30] sm:$0xff]  ;;  %v1008_v38 = vld [vmem:[%s4341_s9 + $0x38] sm:$0xff] }
 0x12d   :  { %3288 = vmatpush3.bf16.msra.mxu0 %v3287_v43  ;;  %v843_v43 = vld [vmem:[%s3760_s12 + $0x30] sm:$0xff] }
 0x12e   :  { %3289 = vmatprep.subr.bf16.mxu0 %v3677_v2  ;;  %v3338_v45 = vpack.c.bf16 %v844_v44, %v843_v43 }
 0x12f   :  { %3285 = vmatpush3.bf16.msra.mxu1 %v3284_v40  ;;  %v841_v40 = vld [vmem:[%s3760_s12 + $0x20] sm:$0xff]  ;;  %s4352_s12 = sld [smem:[#allocation25_spill]] }
 0x130   :  { %3298 = vmatprep.subr.bf16.mxu1 %v3677_v2  ;;  %v3335_v42 = vpack.c.bf16 %v842_v41, %v841_v40  ;;  %v1236_v40 = vld [vmem:[%s4342_s13] sm:$0xff]  ;;  %v1237_v41 = vld [vmem:[%s4342_s13 + $0x8] sm:$0xff] }
 0x131   :  { %3291 = vmatpush3.bf16.msra.mxu0 %v3290_v46  ;;  %v762_v46 = vld [vmem:[%s3755_s6 + $0x30] sm:$0xff]  ;;  %v3383_v43 = vpack.c.bf16 %v1237_v41, %v1236_v40  ;;  %v1665_v40 = vld [vmem:[%s4349_s24 + $0x28] sm:$0xff]  ;;  %s4351_s6 = sld [smem:[#allocation24_spill]] }
 0x132   :  { %3292 = vmatprep.subr.bf16.mxu0 %v3677_v2  ;;  %v3326_v48 = vpack.c.bf16 %v763_v47, %v762_v46  ;;  %v1239_v46 = vld [vmem:[%s4342_s13 + $0x18] sm:$0xff] }
 0x135   :  { %3294 = vmatpush3.bf16.msra.mxu0 %v3293_v49  ;;  %v2574_v49 = vld [vmem:[%s3720_s29] ss:$0 sm:$0xff]  ;;  %s4346_s29 = sld [smem:[#allocation13_spill]] }
 0x136   :  { %3295 = vmatprep.subr.bf16.mxu0 %v3677_v2 }
 0x139   :  { %3297 = vmatpush3.bf16.msra.mxu0 %v3296_v5 }
 0x13a   :  { %3310 = vmatprep.subr.bf16.mxu0 %v3677_v2 }
 0x1fd   :  { %v342_v52 = vpop.f32.mrb[0].mxu1  ;;  %v420_v53 = vpop.f32.mrb[2].mxu0 }
 0x1fe   :  { %v424_v55 = vmax.f32 %v342_v52, %v420_v53  ;;  %v2838_v56 = vpop.f32.mrb[1].mxu1  ;;  %v2857_v57 = vpop.f32.mrb[3].mxu0  ;;  %v916_v53 = vld [vmem:[%s4339_s0] sm:$0xff] }
 0x1ff   :  { %v3347_v57 = vpack.c.bf16 %v1010_v51, %v1009_v50 }
 0x200   :  { %2867 = vmatmul.mubr.msk.f32.vlgmr.msra.gmra.mrb[2].mxu1 %vm436_vm3, %v424_v55 }
 0x201   :  { %3300 = vmatpush3.bf16.msra.mxu1 %v3299_v54  ;;  %2904 = vmatprep.mubr.msk.f32.mxu1 %vm3678_vm0, %v3679_v4  ;;  %v917_v54 = vld [vmem:[%s4339_s0 + $0x8] sm:$0xff] }
 0x202   :  { %3301 = vmatprep.subr.bf16.mxu1 %v3677_v2  ;;  %v3341_v61 = vpack.c.bf16 %v917_v54, %v916_v53  ;;  %v1243_v53 = vld [vmem:[%s4342_s13 + $0x38] sm:$0xff] }
 0x205   :  { %3303 = vmatpush3.bf16.msra.mxu1 %v3302_v60  ;;  %v1012_v60 = vld [vmem:[%s3770_s27 + $0x18] sm:$0xff] }
 0x206   :  { %3304 = vmatprep.subr.bf16.mxu1 %v3677_v2  ;;  %v3350_v0 = vpack.c.bf16 %v1012_v60, %v1011_v59 }
 0x209   :  { %3306 = vmatpush3.bf16.msra.mxu1 %v3305_v63  ;;  %v919_v63 = vld [vmem:[%s4339_s0 + $0x18] sm:$0xff] }
 0x20a   :  { %3307 = vmatprep.subr.bf16.mxu1 %v3677_v2  ;;  %v3344_v5 = vpack.c.bf16 %v919_v63, %v918_v62 }
 0x20d   :  { %3309 = vmatpush3.bf16.msra.mxu1 %v3308_v7  ;;  %v1015_v7 = vld [vmem:[%s3770_s27 + $0x30] sm:$0xff] }
 0x20e   :  { %3316 = vmatprep.subr.bf16.mxu1 %v3677_v2 }
 0x2d3   :  { %v506_v11 = vpop.f32.mrb[2].mxu1 }
 0x2d4   :  { %v507_v12 = vadd.f32 %v2570_v8, %v506_v11  ;;  %v2868_v13 = vpop.f32.mrb[3].mxu1  ;;  %v1016_v8 = vld [vmem:[%s3770_s27 + $0x38] sm:$0xff]  ;;  %v1158_v11 = vld [vmem:[%s4340_s5 + $0x8] sm:$0xff]  ;;  %s4353_s27 = sld [smem:[#allocation23_spill]] }
 0x2d5   :  { %v3356_v9 = vpack.c.bf16 %v1016_v8, %v1015_v7  ;;  %v1159_v13 = vld [vmem:[%s4340_s5 + $0x10] sm:$0xff]  ;;  %v1332_v8 = vld [vmem:[%s4344_s21 + $0x18] sm:$0xff] }
 0x2d6   :  { %v3990_v15 = vmax.f32 %v507_v12, 0.0  ;;  %v3371_v12 = vpack.c.bf16 %v1158_v11, %v1157_v10  ;;  %v1331_v7 = vld [vmem:[%s4344_s21 + $0x10] sm:$0xff]  ;;  %v1417_v11 = vld [vmem:[%s4345_s25 + $0x18] sm:$0xff] }
 0x2d7   :  { %v1416_v10 = vld [vmem:[%s4345_s25 + $0x10] sm:$0xff] }
 0x2d8   :  { %2886 = vmatmul.mubr.msk.f32.vlgmr.msra.gmra.mrb[4].mxu0 %vm272_vm2, %v3990_v15  ;;  %2905 = vmatmul.mubr.msk.f32.vlgmr.msra.gmra.mrb[4].mxu1 %vm272_vm2, %v3990_v15 }
 0x2d9   :  { %3312 = vmatpush3.bf16.msra.mxu0 %v3311_v14  ;;  %2915 = vmatprep.mubr.msk.f32.mxu0 %vm3678_vm0, %v3679_v4  ;;  %v1160_v14 = vld [vmem:[%s4340_s5 + $0x18] sm:$0xff] }
 0x2da   :  { %3313 = vmatprep.subr.bf16.mxu0 %v3677_v2  ;;  %2934 = vmatprep.mubr.msk.f32.mxu1 %vm3678_vm0, %v3679_v4  ;;  %v3374_v16 = vpack.c.bf16 %v1160_v14, %v1159_v13  ;;  %v3404_v13 = vpack.c.bf16 %v1417_v11, %v1416_v10  ;;  %v2593_v11 = vld [vmem:[%s4353_s27] ss:$0 sm:$0xff] }
 0x2db   :  { %3318 = vmatpush3.bf16.msra.mxu1 %v3317_v21  ;;  %v1164_v21 = vld [vmem:[%s4340_s5 + $0x38] sm:$0xff] }
 0x2dc   :  { %3319 = vmatprep.subr.bf16.mxu1 %v3677_v2 }
 0x2dd   :  { %3315 = vmatpush3.bf16.msra.mxu0 %v3314_v18  ;;  %v1162_v18 = vld [vmem:[%s4340_s5 + $0x28] sm:$0xff] }
 0x2de   :  { %3328 = vmatprep.subr.bf16.mxu0 %v3677_v2  ;;  %v3377_v19 = vpack.c.bf16 %v1162_v18, %v1161_v17 }
 0x2df   :  { %3321 = vmatpush3.bf16.msra.mxu1 %v3320_v24 }
 0x2e0   :  { %3322 = vmatprep.subr.bf16.mxu1 %v3677_v2 }
 0x2e3   :  { %3324 = vmatpush3.bf16.msra.mxu1 %v3323_v27 }
 0x2e4   :  { %3325 = vmatprep.subr.bf16.mxu1 %v3677_v2 }
 0x2e7   :  { %3327 = vmatpush3.bf16.msra.mxu1 %v3326_v48  ;;  %v1240_v48 = vld [vmem:[%s4342_s13 + $0x20] sm:$0xff] }
 0x2e8   :  { %3340 = vmatprep.subr.bf16.mxu1 %v3677_v2 }
 0x3ab   :  { %v588_v30 = vpop.f32.mrb[4].mxu0  ;;  %v666_v31 = vpop.f32.mrb[4].mxu1 }
 0x3ac   :  { %v670_v33 = vmax.f32 %v588_v30, %v666_v31  ;;  %v2887_v34 = vpop.f32.mrb[5].mxu0  ;;  %v2906_v35 = vpop.f32.mrb[5].mxu1  ;;  %v1003_v30 = vld [vmem:[%s4341_s9 + $0x10] sm:$0xff]  ;;  %v1004_v31 = vld [vmem:[%s4341_s9 + $0x18] sm:$0xff] }
 0x3ad   :  { %v1006_v34 = vld [vmem:[%s4341_s9 + $0x28] sm:$0xff] }
 0x3ae   :  { %2916 = vmatmul.mubr.msk.f32.vlgmr.msra.gmra.mrb[6].mxu0 %vm436_vm3, %v670_v33  ;;  %v1005_v33 = vld [vmem:[%s4341_s9 + $0x20] sm:$0xff] }
 0x3af   :  { %3330 = vmatpush3.bf16.msra.mxu0 %v3329_v32  ;;  %2953 = vmatprep.mubr.msk.f32.mxu0 %vm3678_vm0, %v3679_v4  ;;  %v3362_v32 = vpack.c.bf16 %v1004_v31, %v1003_v30  ;;  %v3365_v35 = vpack.c.bf16 %v1006_v34, %v1005_v33  ;;  %v1661_v33 = vld [vmem:[%s4349_s24 + $0x8] sm:$0xff] }
 0x3b0   :  { %3331 = vmatprep.subr.bf16.mxu0 %v3677_v2 }
 0x3b3   :  { %3333 = vmatpush3.bf16.msra.mxu0 %v3332_v39  ;;  %v3368_v39 = vpack.c.bf16 %v1008_v38, %v1007_v36  ;;  %v1663_v36 = vld [vmem:[%s4349_s24 + $0x18] sm:$0xff] }
 0x3b4   :  { %3334 = vmatprep.subr.bf16.mxu0 %v3677_v2 }
 0x3b7   :  { %3336 = vmatpush3.bf16.msra.mxu0 %v3335_v42 }
 0x3b8   :  { %3337 = vmatprep.subr.bf16.mxu0 %v3677_v2 }
 0x3bb   :  { %3339 = vmatpush3.bf16.msra.mxu0 %v3338_v45  ;;  %v1238_v45 = vld [vmem:[%s4342_s13 + $0x10] sm:$0xff] }
 0x3bc   :  { %3346 = vmatprep.subr.bf16.mxu0 %v3677_v2  ;;  %v3386_v47 = vpack.c.bf16 %v1239_v46, %v1238_v45 }
 0x481   :  { %v751_v52 = vpop.f32.mrb[6].mxu0 }
 0x482   :  { %v752_v55 = vadd.f32 %v2574_v49, %v751_v52  ;;  %v2917_v56 = vpop.f32.mrb[7].mxu0  ;;  %v1241_v49 = vld [vmem:[%s4342_s13 + $0x28] sm:$0xff] }
 0x483   :  { %v3389_v50 = vpack.c.bf16 %v1241_v49, %v1240_v48  ;;  %v2591_v49 = vld [vmem:[%s4350_s30] ss:$0 sm:$0xff] }
 0x484   :  { %v755_v58 = vmax.f32 %v752_v55, 0.0  ;;  %v2578_v55 = vld [vmem:[%s4343_s17] ss:$0 sm:$0xff] }
 0x486   :  { %2935 = vmatmul.mubr.msk.f32.vlgmr.msra.gmra.mrb[6].mxu1 %vm272_vm2, %v755_v58  ;;  %2954 = vmatmul.mubr.msk.f32.vlgmr.msra.gmra.mrb[8].mxu0 %vm272_vm2, %v755_v58 }
 0x487   :  { %3348 = vmatpush3.bf16.msra.mxu0 %v3347_v57  ;;  %2983 = vmatprep.mubr.msk.f32.mxu0 %vm3678_vm0, %v3679_v4 }
 0x488   :  { %3349 = vmatprep.subr.bf16.mxu0 %v3677_v2  ;;  %3342 = vmatpush3.bf16.msra.mxu1 %v3341_v61 }
 0x489   :  { %3343 = vmatprep.subr.bf16.mxu1 %v3677_v2  ;;  %2964 = vmatprep.mubr.msk.f32.mxu1 %vm3678_vm0, %v3679_v4 }
 0x48b   :  { %3351 = vmatpush3.bf16.msra.mxu0 %v3350_v0  ;;  %v1329_v0 = vld [vmem:[%s4344_s21] sm:$0xff] }
 0x48c   :  { %3352 = vmatprep.subr.bf16.mxu0 %v3677_v2  ;;  %3345 = vmatpush3.bf16.msra.mxu1 %v3344_v5  ;;  %v3395_v5 = vpack.c.bf16 %v1330_v1, %v1329_v0  ;;  %v1829_v1 = vld [vmem:[%s4352_s12 + $0x18] sm:$0xff] }
 0x48d   :  { %3358 = vmatprep.subr.bf16.mxu1 %v3677_v2 }
 0x48f   :  { %3354 = vmatpush3.bf16.msra.mxu0 %v3353_v6  ;;  %v1415_v6 = vld [vmem:[%s4345_s25 + $0x8] sm:$0xff] }
 0x490   :  { %3355 = vmatprep.subr.bf16.mxu0 %v3677_v2 }
 0x493   :  { %3357 = vmatpush3.bf16.msra.mxu0 %v3356_v9  ;;  %v3401_v9 = vpack.c.bf16 %v1415_v6, %v1414_v3  ;;  %v1831_v6 = vld [vmem:[%s4352_s12 + $0x28] sm:$0xff] }
 0x494   :  { %3370 = vmatprep.subr.bf16.mxu0 %v3677_v2 }
 0x496   :  { %2984 = vmatmul.mubr.msk.f32.vlgmr.msra.gmra.mrb[10].mxu0 %vm272_vm2, %v3990_v15  ;;  %v3380_v15 = vpack.c.bf16 %v1164_v21, %v1163_v20  ;;  %v1496_v20 = vld [vmem:[%s4347_s14] sm:$0xff]  ;;  %v1497_v21 = vld [vmem:[%s4347_s14 + $0x8] sm:$0xff] }
 0x497   :  { %3372 = vmatpush3.bf16.msra.mxu0 %v3371_v12  ;;  %3021 = vmatprep.mubr.msk.f32.mxu0 %vm3678_vm0, %v3679_v4  ;;  %v3398_v12 = vpack.c.bf16 %v1332_v8, %v1331_v7  ;;  %v3407_v23 = vpack.c.bf16 %v1497_v21, %v1496_v20  ;;  %v1832_v8 = vld [vmem:[%s4352_s12 + $0x30] sm:$0xff]  ;;  %v1837_v21 = vld [vmem:[%s4354_s22 + $0x18] sm:$0xff] }
 0x498   :  { %3373 = vmatprep.subr.bf16.mxu0 %v3677_v2  ;;  %v1836_v20 = vld [vmem:[%s4354_s22 + $0x10] sm:$0xff] }
 0x49b   :  { %3375 = vmatpush3.bf16.msra.mxu0 %v3374_v16  ;;  %v2584_v16 = vld [vmem:[%s4346_s29] ss:$0 sm:$0xff] }
 0x49c   :  { %3376 = vmatprep.subr.bf16.mxu0 %v3677_v2 }
 0x49f   :  { %3378 = vmatpush3.bf16.msra.mxu0 %v3377_v19 }
 0x4a0   :  { %3379 = vmatprep.subr.bf16.mxu0 %v3677_v2 }
 0x4a3   :  { %3381 = vmatpush3.bf16.msra.mxu0 %v3380_v15  ;;  %v1578_v15 = vld [vmem:[%s4348_s19] sm:$0xff] }
 0x4a4   :  { %3394 = vmatprep.subr.bf16.mxu0 %v3677_v2 }
 0x4a6   :  { %3022 = vmatmul.mubr.msk.f32.vlgmr.msra.gmra.mrb[12].mxu0 %vm272_vm2, %v755_v58 }
 0x4a7   :  { %3051 = vmatprep.mubr.msk.f32.mxu0 %vm3678_vm0, %v3679_v4  ;;  %3396 = vmatpush3.bf16.msra.mxu0 %v3395_v5  ;;  %v1830_v5 = vld [vmem:[%s4352_s12 + $0x20] sm:$0xff] }
 0x4a8   :  { %3397 = vmatprep.subr.bf16.mxu0 %v3677_v2  ;;  %v3455_v7 = vpack.c.bf16 %v1831_v6, %v1830_v5 }
 0x4ab   :  { %3399 = vmatpush3.bf16.msra.mxu0 %v3398_v12 }
 0x4ac   :  { %3406 = vmatprep.subr.bf16.mxu0 %v3677_v2 }
 0x559   :  { %v833_v24 = vpop.f32.mrb[6].mxu1  ;;  %v911_v25 = vpop.f32.mrb[8].mxu0 }
 0x55a   :  { %v915_v27 = vmax.f32 %v833_v24, %v911_v25  ;;  %v2936_v28 = vpop.f32.mrb[7].mxu1  ;;  %v2955_v29 = vpop.f32.mrb[9].mxu0  ;;  %v3413_v24 = vpack.c.bf16 %v1579_v22, %v1578_v15  ;;  %v1498_v25 = vld [vmem:[%s4347_s14 + $0x10] sm:$0xff] }
 0x55b   :  { %v1581_v28 = vld [vmem:[%s4348_s19 + $0x18] sm:$0xff] }
 0x55c   :  { %2965 = vmatmul.mubr.msk.f32.vlgmr.msra.gmra.mrb[8].mxu1 %vm436_vm3, %v915_v27  ;;  %v1580_v27 = vld [vmem:[%s4348_s19 + $0x10] sm:$0xff] }
 0x55d   :  { %3360 = vmatpush3.bf16.msra.mxu1 %v3359_v26  ;;  %3002 = vmatprep.mubr.msk.f32.mxu1 %vm3678_vm0, %v3679_v4  ;;  %v1499_v26 = vld [vmem:[%s4347_s14 + $0x18] sm:$0xff]  ;;  %v3416_v31 = vpack.c.bf16 %v1581_v28, %v1580_v27  ;;  %v1840_v27 = vld [vmem:[%s4354_s22 + $0x30] sm:$0xff] }
 0x55e   :  { %3361 = vmatprep.subr.bf16.mxu1 %v3677_v2  ;;  %v3410_v30 = vpack.c.bf16 %v1499_v26, %v1498_v25  ;;  %v1839_v25 = vld [vmem:[%s4354_s22 + $0x28] sm:$0xff]  ;;  %v1841_v28 = vld [vmem:[%s4354_s22 + $0x38] sm:$0xff] }
 0x561   :  { %3363 = vmatpush3.bf16.msra.mxu1 %v3362_v32  ;;  %v1660_v32 = vld [vmem:[%s4349_s24] sm:$0xff] }
 0x562   :  { %3364 = vmatprep.subr.bf16.mxu1 %v3677_v2  ;;  %v3419_v34 = vpack.c.bf16 %v1661_v33, %v1660_v32  ;;  %v2083_v32 = vld [vmem:[%s4356_s26 + $0x8] sm:$0xff] }
 0x565   :  { %3366 = vmatpush3.bf16.msra.mxu1 %v3365_v35  ;;  %v1662_v35 = vld [vmem:[%s4349_s24 + $0x10] sm:$0xff] }
 0x566   :  { %3367 = vmatprep.subr.bf16.mxu1 %v3677_v2  ;;  %v3422_v38 = vpack.c.bf16 %v1663_v36, %v1662_v35  ;;  %v2084_v35 = vld [vmem:[%s4356_s26 + $0x10] sm:$0xff]  ;;  %v2085_v36 = vld [vmem:[%s4356_s26 + $0x18] sm:$0xff] }
 0x569   :  { %v1083_v42 = vpop.f32.mrb[10].mxu0  ;;  %3369 = vmatpush3.bf16.msra.mxu1 %v3368_v39  ;;  %v1664_v39 = vld [vmem:[%s4349_s24 + $0x20] sm:$0xff] }
 0x56a   :  { %v2985_v44 = vpop.f32.mrb[11].mxu0  ;;  %3382 = vmatprep.subr.bf16.mxu1 %v3677_v2  ;;  %v3425_v41 = vpack.c.bf16 %v1665_v40, %v1664_v39 }
 0x56c   :  { %3003 = vmatmul.mubr.msk.f32.vlgmr.msra.gmra.mrb[10].mxu1 %vm272_vm2, %v3946_v37  ;;  %v1242_v37 = vld [vmem:[%s4342_s13 + $0x30] sm:$0xff] }
 0x56d   :  { %3384 = vmatpush3.bf16.msra.mxu1 %v3383_v43  ;;  %3040 = vmatprep.mubr.msk.f32.mxu1 %vm3678_vm0, %v3679_v4  ;;  %v3392_v54 = vpack.c.bf16 %v1243_v53, %v1242_v37  ;;  %v1667_v43 = vld [vmem:[%s4349_s24 + $0x38] sm:$0xff] }
 0x56e   :  { %3385 = vmatprep.subr.bf16.mxu1 %v3677_v2 }
 0x571   :  { %3387 = vmatpush3.bf16.msra.mxu1 %v3386_v47 }
 0x572   :  { %3388 = vmatprep.subr.bf16.mxu1 %v3677_v2 }
 0x575   :  { %3390 = vmatpush3.bf16.msra.mxu1 %v3389_v50 }
 0x576   :  { %3391 = vmatprep.subr.bf16.mxu1 %v3677_v2 }
 0x579   :  { %v1231_v51 = vpop.f32.mrb[12].mxu0  ;;  %3393 = vmatpush3.bf16.msra.mxu1 %v3392_v54 }
 0x57a   :  { %v3023_v52 = vpop.f32.mrb[13].mxu0  ;;  %3400 = vmatprep.subr.bf16.mxu1 %v3677_v2 }
 0x62f   :  { %v996_v56 = vpop.f32.mrb[8].mxu1 }
 0x630   :  { %v997_v57 = vadd.f32 %v2578_v55, %v996_v56  ;;  %v2966_v58 = vpop.f32.mrb[9].mxu1  ;;  %v1749_v55 = vld [vmem:[%s4351_s6] sm:$0xff]  ;;  %v1750_v56 = vld [vmem:[%s4351_s6 + $0x8] sm:$0xff] }
 0x631   :  { %v3431_v58 = vpack.c.bf16 %v1750_v56, %v1749_v55  ;;  %v2000_v55 = vld [vmem:[%s4358_s1 + $0x18] sm:$0xff] }
 0x632   :  { %v1000_v59 = vmax.f32 %v997_v57, 0.0  ;;  %v1751_v57 = vld [vmem:[%s4351_s6 + $0x10] sm:$0xff] }
 0x634   :  { %3041 = vmatmul.mubr.msk.f32.vlgmr.msra.gmra.mrb[12].mxu1 %vm272_vm2, %v1000_v59  ;;  %v1752_v59 = vld [vmem:[%s4351_s6 + $0x18] sm:$0xff] }
 0x635   :  { %3062 = vmatprep.mubr.msk.f32.mxu1 %vm3678_vm0, %v3679_v4  ;;  %3402 = vmatpush3.bf16.msra.mxu1 %v3401_v9  ;;  %v1833_v9 = vld [vmem:[%s4352_s12 + $0x38] sm:$0xff] }
 0x636   :  { %3403 = vmatprep.subr.bf16.mxu1 %v3677_v2  ;;  %v3458_v10 = vpack.c.bf16 %v1833_v9, %v1832_v8  ;;  %v2078_v9 = vld [vmem:[%s4360_s7 + $0x20] sm:$0xff] }
 0x639   :  { %3405 = vmatpush3.bf16.msra.mxu1 %v3404_v13 }
 0x63a   :  { %3412 = vmatprep.subr.bf16.mxu1 %v3677_v2 }
 0x63f   :  { %v1153_v60 = vpop.f32.mrb[10].mxu1 }
 0x640   :  { %v1154_v61 = vadd.f32 %v1153_v60, %v1083_v42  ;;  %v3004_v62 = vpop.f32.mrb[11].mxu1  ;;  %v1666_v42 = vld [vmem:[%s4349_s24 + $0x30] sm:$0xff]  ;;  %v3434_v60 = vpack.c.bf16 %v1752_v59, %v1751_v57 }
 0x641   :  { %v3428_v44 = vpack.c.bf16 %v1667_v43, %v1666_v42  ;;  %v1827_v62 = vld [vmem:[%s4352_s12 + $0x8] sm:$0xff]  ;;  %v2086_v42 = vld [vmem:[%s4356_s26 + $0x20] sm:$0xff] }
 0x642   :  { %v1235_v63 = vadd.f32 %v1231_v51, %v1154_v61  ;;  %v1826_v61 = vld [vmem:[%s4352_s12] sm:$0xff]  ;;  %v2087_v43 = vld [vmem:[%s4356_s26 + $0x28] sm:$0xff] }
 0x643   :  { %v3449_v0 = vpack.c.bf16 %v1827_v62, %v1826_v61  ;;  %v2074_v62 = vld [vmem:[%s4360_s7] sm:$0xff] }
 0x707   :  { %v1313_v14 = vpop.f32.mrb[12].mxu1 }
 0x708   :  { %v1317_v17 = vadd.f32 %v1313_v14, %v1235_v63  ;;  %v3042_v18 = vpop.f32.mrb[13].mxu1  ;;  %v1828_v63 = vld [vmem:[%s4352_s12 + $0x10] sm:$0xff] }
 0x709   :  { %v3452_v3 = vpack.c.bf16 %v1829_v1, %v1828_v63  ;;  %v2075_v63 = vld [vmem:[%s4360_s7 + $0x8] sm:$0xff]  ;;  %v2076_v1 = vld [vmem:[%s4360_s7 + $0x10] sm:$0xff] }
 0x70a   :  { %v1325_v19 = vadd.f32 %v2584_v16, %v1317_v17  ;;  %v1834_v16 = vld [vmem:[%s4354_s22] sm:$0xff]  ;;  %v1835_v17 = vld [vmem:[%s4354_s22 + $0x8] sm:$0xff] }
 0x70b   :  { %v3437_v18 = vpack.c.bf16 %v1835_v17, %v1834_v16  ;;  %v2330_v16 = vld [vmem:[%s3890_s3] sm:$0xff]  ;;  %v2331_v17 = vld [vmem:[%s3890_s3 + $0x8] sm:$0xff] }
 0x70c   :  { %3568 = vtanh.f32 %v1325_v19  ;;  %v2589_v19 = vld [vmem:[%s4355_s23] ss:$0 sm:$0xff] }
 0x716   :  { %v3569_v29 = vpop.eup %3568 }
 0x717   :  { %3052 = vmatmul.mubr.msk.f32.vlgmr.msra.gmra.mrb[14].mxu0 %vm436_vm3, %v3569_v29  ;;  %3063 = vmatmul.mubr.msk.f32.vlgmr.msra.gmra.mrb[14].mxu1 %vm436_vm3, %v3569_v29  ;;  %1328 = vst.msk [vmem:[#allocation4] sm:$0x3] %vm1327_vm4, %v3569_v29 }
 0x718   :  { %3408 = vmatpush3.bf16.msra.mxu0 %v3407_v23  ;;  %3414 = vmatpush3.bf16.msra.mxu1 %v3413_v24  ;;  %v3440_v23 = vpack.c.bf16 %v1837_v21, %v1836_v20  ;;  %v1838_v24 = vld [vmem:[%s4354_s22 + $0x20] sm:$0xff]  ;;  %v2332_v20 = vld [vmem:[%s3890_s3 + $0x10] sm:$0xff]  ;;  %v2333_v21 = vld [vmem:[%s3890_s3 + $0x18] sm:$0xff] }
 0x719   :  { %3409 = vmatprep.subr.bf16.mxu0 %v3677_v2  ;;  %3415 = vmatprep.subr.bf16.mxu1 %v3677_v2  ;;  %v3443_v26 = vpack.c.bf16 %v1839_v25, %v1838_v24  ;;  %v3500_v24 = vpack.c.bf16 %v2333_v21, %v2332_v20  ;;  %v2334_v25 = vld [vmem:[%s3890_s3 + $0x20] sm:$0xff] }
 0x71a   :  { %3073 = vmatprep.mubr.msk.f32.mxu0 %vm3678_vm0, %v3679_v4  ;;  %3084 = vmatprep.mubr.msk.f32.mxu1 %vm3678_vm0, %v3679_v4 }
 0x71c   :  { %3411 = vmatpush3.bf16.msra.mxu0 %v3410_v30  ;;  %3417 = vmatpush3.bf16.msra.mxu1 %v3416_v31  ;;  %v2082_v31 = vld [vmem:[%s4356_s26] sm:$0xff] }
 0x71d   :  { %3418 = vmatprep.subr.bf16.mxu0 %v3677_v2  ;;  %3430 = vmatprep.subr.bf16.mxu1 %v3677_v2  ;;  %v3467_v33 = vpack.c.bf16 %v2083_v32, %v2082_v31  ;;  %v2245_v31 = vld [vmem:[%s4362_s11] sm:$0xff]  ;;  %v2246_v32 = vld [vmem:[%s4362_s11 + $0x8] sm:$0xff] }
 0x71f   :  { %3074 = vmatmul.mubr.msk.f32.vlgmr.msra.gmra.mrb[16].mxu0 %vm436_vm3, %v3569_v29  ;;  %3085 = vmatmul.mubr.msk.f32.vlgmr.msra.gmra.mrb[16].mxu1 %vm436_vm3, %v3569_v29  ;;  %v3446_v29 = vpack.c.bf16 %v1841_v28, %v1840_v27  ;;  %v2336_v28 = vld [vmem:[%s3890_s3 + $0x30] sm:$0xff] }
 0x720   :  { %3103 = vmatprep.mubr.msk.f32.mxu0 %vm3678_vm0, %v3679_v4  ;;  %3114 = vmatprep.mubr.msk.f32.mxu1 %vm3678_vm0, %v3679_v4 }
 0x721   :  { %3420 = vmatpush3.bf16.msra.mxu0 %v3419_v34  ;;  %3432 = vmatpush3.bf16.msra.mxu1 %v3431_v58  ;;  %v2587_v34 = vld [vmem:[%s4357_s28] ss:$0 sm:$0xff] }
 0x722   :  { %3421 = vmatprep.subr.bf16.mxu0 %v3677_v2  ;;  %3433 = vmatprep.subr.bf16.mxu1 %v3677_v2  ;;  %v2598_v58 = vld [vmem:[%s4359_s2] ss:$0 sm:$0xff] }
 0x725   :  { %3423 = vmatpush3.bf16.msra.mxu0 %v3422_v38  ;;  %3435 = vmatpush3.bf16.msra.mxu1 %v3434_v60 }
 0x726   :  { %3424 = vmatprep.subr.bf16.mxu0 %v3677_v2  ;;  %3436 = vmatprep.subr.bf16.mxu1 %v3677_v2 }
 0x729   :  { %3426 = vmatpush3.bf16.msra.mxu0 %v3425_v41  ;;  %v3470_v41 = vpack.c.bf16 %v2085_v36, %v2084_v35  ;;  %v2248_v35 = vld [vmem:[%s4362_s11 + $0x18] sm:$0xff] }
 0x72a   :  { %3427 = vmatprep.subr.bf16.mxu0 %v3677_v2 }
 0x72d   :  { %3429 = vmatpush3.bf16.msra.mxu0 %v3428_v44  ;;  %v3473_v44 = vpack.c.bf16 %v2087_v43, %v2086_v42  ;;  %v2322_v43 = vld [vmem:[%s4364_s16] sm:$0xff] }
 0x72e   :  { %3448 = vmatprep.subr.bf16.mxu0 %v3677_v2 }
 0x7ea   :  { %v4159_v45 = vpop.f32.mrb[14].mxu0  ;;  %v4161_v46 = vpop.f32.mrb[14].mxu1 }
 0x7eb   :  { %v3053_v47 = vpop.f32.mrb[15].mxu0  ;;  %v3064_v48 = vpop.f32.mrb[15].mxu1  ;;  %v1492_v40 = vadd.f32 %v2587_v34, %v4161_v46  ;;  %v2089_v46 = vld [vmem:[%s4356_s26 + $0x38] sm:$0xff]  ;;  %v3491_v34 = vpack.c.bf16 %v2246_v32, %v2245_v31 }
 0x7ec   :  { %v2088_v47 = vld [vmem:[%s4356_s26 + $0x30] sm:$0xff] }
 0x7ed   :  { %v3476_v48 = vpack.c.bf16 %v2089_v46, %v2088_v47  ;;  %v2324_v46 = vld [vmem:[%s4364_s16 + $0x10] sm:$0xff] }
 0x7f2   :  { %v1573_v50 = vpop.f32.mrb[16].mxu0  ;;  %v1655_v51 = vpop.f32.mrb[16].mxu1 }
 0x7f3   :  { %v1656_v52 = vadd.f32 %v2591_v49, %v1655_v51  ;;  %v3075_v37 = vpop.f32.mrb[17].mxu0  ;;  %v3086_v53 = vpop.f32.mrb[17].mxu1  ;;  %v1574_v22 = vadd.f32 %v2589_v19, %v1573_v50  ;;  %v2585_v19 = vld [vmem:[%s4361_s10] ss:$0 sm:$0xff] }
 0x7f4   :  { %v1998_v37 = vld [vmem:[%s4358_s1 + $0x8] sm:$0xff]  ;;  %v1999_v53 = vld [vmem:[%s4358_s1 + $0x10] sm:$0xff] }
 0x7f5   :  { %3570 = vtanh.f32 %v1656_v52  ;;  %v1997_v52 = vld [vmem:[%s4358_s1] sm:$0xff]  ;;  %v3464_v56 = vpack.c.bf16 %v2000_v55, %v1999_v53  ;;  %v2327_v53 = vld [vmem:[%s4364_s16 + $0x28] sm:$0xff]  ;;  %v2328_v55 = vld [vmem:[%s4364_s16 + $0x30] sm:$0xff] }
 0x7ff   :  { %v3571_v54 = vpop.eup %3570 }
 0x800   :  { %3104 = vmatmul.mubr.msk.f32.vlgmr.msra.gmra.mrb[18].mxu0 %vm272_vm2, %v3571_v54  ;;  %v3461_v54 = vpack.c.bf16 %v1998_v37, %v1997_v52  ;;  %v2326_v37 = vld [vmem:[%s4364_s16 + $0x20] sm:$0xff] }
 0x801   :  { %3152 = vmatprep.mubr.msk.f32.mxu0 %vm3678_vm0, %v3679_v4  ;;  %3450 = vmatpush3.bf16.msra.mxu0 %v3449_v0  ;;  %v3479_v0 = vpack.c.bf16 %v2075_v63, %v2074_v62 }
 0x802   :  { %3451 = vmatprep.subr.bf16.mxu0 %v3677_v2 }
 0x805   :  { %3453 = vmatpush3.bf16.msra.mxu0 %v3452_v3  ;;  %v2077_v3 = vld [vmem:[%s4360_s7 + $0x18] sm:$0xff] }
 0x806   :  { %3454 = vmatprep.subr.bf16.mxu0 %v3677_v2  ;;  %v3482_v8 = vpack.c.bf16 %v2077_v3, %v2076_v1 }
 0x809   :  { %3456 = vmatpush3.bf16.msra.mxu0 %v3455_v7 }
 0x80a   :  { %3457 = vmatprep.subr.bf16.mxu0 %v3677_v2 }
 0x80d   :  { %3459 = vmatpush3.bf16.msra.mxu0 %v3458_v10  ;;  %v2079_v10 = vld [vmem:[%s4360_s7 + $0x28] sm:$0xff] }
 0x80e   :  { %3466 = vmatprep.subr.bf16.mxu0 %v3677_v2 }
 0x8d3   :  { %v1744_v12 = vpop.f32.mrb[18].mxu0 }
 0x8d4   :  { %v1745_v13 = vadd.f32 %v2593_v11, %v1744_v12  ;;  %v3105_v14 = vpop.f32.mrb[19].mxu0  ;;  %v3485_v11 = vpack.c.bf16 %v2079_v10, %v2078_v9  ;;  %v2080_v12 = vld [vmem:[%s4360_s7 + $0x30] sm:$0xff] }
 0x8d6   :  { %3572 = vtanh.f32 %v1745_v13  ;;  %v2081_v13 = vld [vmem:[%s4360_s7 + $0x38] sm:$0xff] }
 0x8d7   :  { %3574 = vtanh.f32 %v1574_v22  ;;  %v3488_v14 = vpack.c.bf16 %v2081_v13, %v2080_v12 }
 0x8d8   :  { %3576 = vtanh.f32 %v1492_v40 }
 0x8e0   :  { %v3573_v15 = vpop.eup %3572 }
 0x8e1   :  { %3115 = vmatmul.mubr.msk.f32.vlgmr.msra.gmra.mrb[18].mxu1 %vm436_vm3, %v3573_v15  ;;  %v3575_v30 = vpop.eup %3574 }
 0x8e2   :  { %3438 = vmatpush3.bf16.msra.mxu1 %v3437_v18  ;;  %3133 = vmatprep.mubr.msk.f32.mxu1 %vm3678_vm0, %v3679_v4  ;;  %v3577_v49 = vpop.eup %3576  ;;  %v3497_v18 = vpack.c.bf16 %v2331_v17, %v2330_v16 }
 0x8e3   :  { %3439 = vmatprep.subr.bf16.mxu1 %v3677_v2 }
 0x8e6   :  { %3441 = vmatpush3.bf16.msra.mxu1 %v3440_v23  ;;  %v1410_v23 = vadd.f32 %v2585_v19, %v4159_v45  ;;  %v2337_v45 = vld [vmem:[%s3890_s3 + $0x38] sm:$0xff] }
 0x8e7   :  { %3442 = vmatprep.subr.bf16.mxu1 %v3677_v2 }
 0x8ea   :  { %3444 = vmatpush3.bf16.msra.mxu1 %v3443_v26  ;;  %v2335_v26 = vld [vmem:[%s3890_s3 + $0x28] sm:$0xff]  ;;  %s3680_s3 = smov [#allocation4]  }
 0x8eb   :  { %3445 = vmatprep.subr.bf16.mxu1 %v3677_v2  ;;  %v3503_v27 = vpack.c.bf16 %v2335_v26, %v2334_v25  ;;  %s2511_s18 = sshll.u32 %s3680_s3, 4  ;;  %s2512_s18 = int_to_ptr.vmem [resolvable:$true] %s2511_s18 }
 0x8ec   :  { %s3586_s0 = scalar_lea.vmem %s2512_s18, 32  ;;  %p3591_p1 = scmp.lt.s32.totalorder %s2512_s18, %s2512_s18 }
 0x8ed   :  { %p3587_p0 = scmp.ne.s32.totalorder %s2512_s18, %s3586_s0  ;;  %p3592_p2 = scmp.lt.s32.totalorder %s3586_s0, %s3586_s0 }
 0x8ee   :  { %3447 = vmatpush3.bf16.msra.mxu1 %v3446_v29  ;;  %v3506_v29 = vpack.c.bf16 %v2337_v45, %v2336_v28 }
 0x8ef   :  { %3460 = vmatprep.subr.bf16.mxu1 %v3677_v2  ;;  %p3593_p3 = por %p3592_p2, %p3591_p1 }
 0x8f1   :  { %3134 = vmatmul.mubr.msk.f32.vlgmr.msra.gmra.mrb[20].mxu1 %vm272_vm2, %v3575_v30  ;;  %p3594_p4 = pnand %p3593_p3, %p3587_p0 }
 0x8f2   :  { %3163 = vmatprep.mubr.msk.f32.mxu1 %vm3678_vm0, %v3679_v4  ;;  %3462 = vmatpush3.bf16.msra.mxu1 %v3461_v54  ;;  %v3515_v54 = vpack.c.bf16 %v2327_v53, %v2326_v37 }
 0x8f3   :  { %3463 = vmatprep.subr.bf16.mxu1 %v3677_v2 }
 0x8f6   :  { %3465 = vmatpush3.bf16.msra.mxu1 %v3464_v56  ;;  %v2329_v56 = vld [vmem:[%s4364_s16 + $0x38] sm:$0xff] }
 0x8f7   :  { %3478 = vmatprep.subr.bf16.mxu1 %v3677_v2 }
 0x9b4   :  { %v1822_v38 = vpop.f32.mrb[18].mxu1 }
 0x9b5   :  { %v3116_v39 = vpop.f32.mrb[19].mxu1  ;;  %3153 = vmatmul.mubr.msk.f32.vlgmr.msra.gmra.mrb[20].mxu0 %vm272_vm2, %v1822_v38 }
 0x9b6   :  { %3468 = vmatpush3.bf16.msra.mxu0 %v3467_v33  ;;  %3182 = vmatprep.mubr.msk.f32.mxu0 %vm3678_vm0, %v3679_v4  ;;  %v2247_v33 = vld [vmem:[%s4362_s11 + $0x10] sm:$0xff]  ;;  %v2602_v39 = vld [vmem:[%s4363_s15] ss:$0 sm:$0xff] }
 0x9b7   :  { %3469 = vmatprep.subr.bf16.mxu0 %v3677_v2  ;;  %v3494_v36 = vpack.c.bf16 %v2248_v35, %v2247_v33 }
 0x9ba   :  { %3471 = vmatpush3.bf16.msra.mxu0 %v3470_v41 }
 0x9bb   :  { %3472 = vmatprep.subr.bf16.mxu0 %v3677_v2 }
 0x9be   :  { %3474 = vmatpush3.bf16.msra.mxu0 %v3473_v44  ;;  %v2323_v44 = vld [vmem:[%s4364_s16 + $0x8] sm:$0xff] }
 0x9bf   :  { %3475 = vmatprep.subr.bf16.mxu0 %v3677_v2  ;;  %v3509_v47 = vpack.c.bf16 %v2323_v44, %v2322_v43 }
 0x9c2   :  { %3477 = vmatpush3.bf16.msra.mxu0 %v3476_v48  ;;  %v2325_v48 = vld [vmem:[%s4364_s16 + $0x18] sm:$0xff] }
 0x9c3   :  { %3490 = vmatprep.subr.bf16.mxu0 %v3677_v2  ;;  %v3512_v52 = vpack.c.bf16 %v2325_v48, %v2324_v46 }
 0x9c4   :  { %v1911_v50 = vpop.f32.mrb[20].mxu1 }
 0x9c5   :  { %v3135_v51 = vpop.f32.mrb[21].mxu1  ;;  %3183 = vmatmul.mubr.msk.f32.vlgmr.msra.gmra.mrb[22].mxu0 %vm272_vm2, %v3577_v49 }
 0x9c6   :  { %3212 = vmatprep.mubr.msk.f32.mxu0 %vm3678_vm0, %v3679_v4  ;;  %3492 = vmatpush3.bf16.msra.mxu0 %v3491_v34 }
 0x9c7   :  { %3493 = vmatprep.subr.bf16.mxu0 %v3677_v2 }
 0x9ca   :  { %3495 = vmatpush3.bf16.msra.mxu0 %v3494_v36 }
 0x9cb   :  { %3508 = vmatprep.subr.bf16.mxu0 %v3677_v2 }
 0xa88   :  { %v1984_v57 = vpop.f32.mrb[20].mxu0 }
 0xa89   :  { %v1985_v59 = vadd.f32 %v1984_v57, %v1911_v50  ;;  %v3154_v60 = vpop.f32.mrb[21].mxu0  ;;  %v3518_v57 = vpack.c.bf16 %v2329_v56, %v2328_v55 }
 0xa8b   :  { %v1995_v61 = vadd.f32 %v2598_v58, %v1985_v59 }
 0xa8d   :  { %3578 = vtanh.f32 %v1995_v61 }
 0xa8e   :  { %3580 = vtanh.f32 %v1410_v23 }
 0xa97   :  { %v3579_v5 = vpop.eup %3578 }
 0xa98   :  { %v2159_v6 = vpop.f32.mrb[22].mxu0  ;;  %3164 = vmatmul.mubr.msk.f32.vlgmr.msra.gmra.mrb[22].mxu1 %vm436_vm3, %v3579_v5  ;;  %v3581_v30 = vpop.eup %3580 }
 0xa99   :  { %v3184_v7 = vpop.f32.mrb[23].mxu0  ;;  %3480 = vmatpush3.bf16.msra.mxu1 %v3479_v0  ;;  %3201 = vmatprep.mubr.msk.f32.mxu1 %vm3678_vm0, %v3679_v4 }
 0xa9a   :  { %3481 = vmatprep.subr.bf16.mxu1 %v3677_v2 }
 0xa9d   :  { %3483 = vmatpush3.bf16.msra.mxu1 %v3482_v8 }
 0xa9e   :  { %3484 = vmatprep.subr.bf16.mxu1 %v3677_v2 }
 0xaa1   :  { %3486 = vmatpush3.bf16.msra.mxu1 %v3485_v11 }
 0xaa2   :  { %3487 = vmatprep.subr.bf16.mxu1 %v3677_v2 }
 0xaa5   :  { %3489 = vmatpush3.bf16.msra.mxu1 %v3488_v14 }
 0xaa6   :  { %3496 = vmatprep.subr.bf16.mxu1 %v3677_v2 }
 0xb6b   :  { %v2070_v15 = vpop.f32.mrb[22].mxu1 }
 0xb6c   :  { %v3165_v22 = vpop.f32.mrb[23].mxu1  ;;  %3202 = vmatmul.mubr.msk.f32.vlgmr.msra.gmra.mrb[24].mxu1 %vm272_vm2, %v2070_v15 }
 0xb6d   :  { %3498 = vmatpush3.bf16.msra.mxu1 %v3497_v18  ;;  %3231 = vmatprep.mubr.msk.f32.mxu1 %vm3678_vm0, %v3679_v4 }
 0xb6e   :  { %3499 = vmatprep.subr.bf16.mxu1 %v3677_v2 }
 0xb71   :  { %3501 = vmatpush3.bf16.msra.mxu1 %v3500_v24 }
 0xb72   :  { %3502 = vmatprep.subr.bf16.mxu1 %v3677_v2 }
 0xb75   :  { %3504 = vmatpush3.bf16.msra.mxu1 %v3503_v27 }
 0xb76   :  { %3505 = vmatprep.subr.bf16.mxu1 %v3677_v2 }
 0xb79   :  { %3507 = vmatpush3.bf16.msra.mxu1 %v3506_v29 }
 0xb7c   :  { %3232 = vmatmul.mubr.msk.f32.vlgmr.msra.gmra.mrb[26].mxu1 %vm272_vm2, %v3581_v30 }
 0xc3f   :  { %v2232_v38 = vpop.f32.mrb[24].mxu1 }
 0xc40   :  { %v2233_v40 = vadd.f32 %v2232_v38, %v2159_v6  ;;  %v3203_v41 = vpop.f32.mrb[25].mxu1 }
 0xc42   :  { %v2243_v42 = vadd.f32 %v2602_v39, %v2233_v40 }
 0xc44   :  { %3582 = vtanh.f32 %v2243_v42 }
 0xc4e   :  { %v3583_v49 = vpop.eup %3582 }
 0xc4f   :  { %v2407_v50 = vpop.f32.mrb[26].mxu1  ;;  %3213 = vmatmul.mubr.msk.f32.vlgmr.msra.gmra.mrb[24].mxu0 %vm436_vm3, %v3583_v49 }
 0xc50   :  { %v3233_v51 = vpop.f32.mrb[27].mxu1  ;;  %3510 = vmatpush3.bf16.msra.mxu0 %v3509_v47  ;;  %3250 = vmatprep.mubr.msk.f32.mxu0 %vm3678_vm0, %v3679_v4 }
 0xc51   :  { %3511 = vmatprep.subr.bf16.mxu0 %v3677_v2 }
 0xc54   :  { %3513 = vmatpush3.bf16.msra.mxu0 %v3512_v52 }
 0xc55   :  { %3514 = vmatprep.subr.bf16.mxu0 %v3677_v2 }
 0xc58   :  { %3516 = vmatpush3.bf16.msra.mxu0 %v3515_v54 }
 0xc59   :  { %3517 = vmatprep.subr.bf16.mxu0 %v3677_v2 }
 0xc5c   :  { %3519 = vmatpush3.bf16.msra.mxu0 %v3518_v57 }
 0xd22   :  { %v2318_v58 = vpop.f32.mrb[24].mxu0 }
 0xd23   :  { %v3214_v59 = vpop.f32.mrb[25].mxu0  ;;  %3251 = vmatmul.mubr.msk.f32.vlgmr.msra.gmra.mrb[26].mxu0 %vm272_vm2, %v2318_v58 }
 0xd24   :  { %3597 = shalt.err (!%p3594_p4)
}
 0xd25   :  { %s3598_s5 = scalar_lea.hbm %s3905_s20, 32 }
 0xd26   :  { %p3599_p5 = scmp.ne.s32.totalorder %s3905_s20, %s3598_s5  ;;  %p3602_p6 = scmp.lt.u32.totalorder %s3598_s5, %s3905_s20 }
 0xd28   :  { %p3604_p7 = pnand %p3602_p6, %p3599_p5 }
 0xd2a   :  { %3607 = shalt.err (!%p3604_p7)
}
 0xd2b   :  { %2514 = dma.vmem_to_hbm [thread:$0]  %s2512_s18, 32, %s3905_s20, [#allocation5]   ;;  %v2606_v4 = vld [vmem:[%s3895_s4] ss:$0 sm:$0xff]  ;;  %vm2493_vm5 = vcmask 123904  }
 0xd2c   :  { %s3681_s9 = smov [#allocation2]  }
 0xd2d   :  { %s2501_s13 = sshll.u32 %s3681_s9, 4  ;;  %s2502_s13 = int_to_ptr.vmem [resolvable:$true] %s2501_s13 }
 0xd2e   :  { %s3608_s17 = scalar_lea.vmem %s2502_s13, 32  ;;  %p3613_p9 = scmp.lt.s32.totalorder %s2502_s13, %s2502_s13 }
 0xd2f   :  { %p3609_p8 = scmp.ne.s32.totalorder %s2502_s13, %s3608_s17  ;;  %p3614_p10 = scmp.lt.s32.totalorder %s3608_s17, %s3608_s17 }
 0xd31   :  { %p3615_p11 = por %p3614_p10, %p3613_p9 }
 0xd33   :  { %p3616_p12 = pnand %p3615_p11, %p3609_p8 }
 0xdf6   :  { %v2480_v2 = vpop.f32.mrb[26].mxu0 }
 0xdf7   :  { %v2481_v60 = vadd.f32 %v2480_v2, %v2407_v50  ;;  %v3252_v61 = vpop.f32.mrb[27].mxu0 }
 0xdf9   :  { %v2491_v62 = vadd.f32 %v2606_v4, %v2481_v60 }
 0xdfb   :  { %3584 = vtanh.f32 %v2491_v62 }
 0xe05   :  { %v3585_v63 = vpop.eup %3584 }
 0xe06   :  { %2494 = vst.msk [vmem:[#allocation2] sm:$0x3] %vm2493_vm5, %v3585_v63 }
 0xe07   :  { %3619 = shalt.err (!%p3616_p12)
}
 0xe08   :  { %s3620_s20 = scalar_lea.hbm %s3900_s8, 32 }
 0xe09   :  { %p3621_p13 = scmp.ne.s32.totalorder %s3900_s8, %s3620_s20  ;;  %p3624_p0 = scmp.lt.u32.totalorder %s3620_s20, %s3900_s8 }
 0xe0b   :  { %p3626_p1 = pnand %p3624_p0, %p3621_p13 }
 0xe0d   :  { %3629 = shalt.err (!%p3626_p1)
}
 0xe0e   :  { %2504 = dma.vmem_to_hbm [thread:$0]  %s2502_s13, 32, %s3900_s8, [#allocation3]  }
 0xe0f   :  { %3630 = dma.done.wait [#allocation3], 32  }
 0xe10   :  { %3631 = vsyncadd [#allocation3], 4294967264 }
 0xe11   :  { %3632 = dma.done.wait [#allocation5], 32  }
 0xe12   :  { %3633 = vsyncadd [#allocation5], 4294967264 }
 0xe13   :  { %2521 = vsyncpa [#allocation3], 1 }
 0xe14   :  { %2522 = vsyncpa [#allocation5], 1 }

</bundles_post_ra>
